<compile_context>
chip_gen: v6e
topology: v6e:2x2x1
jax: 0.10.0
libtpu: 0.0.40
codegen_flags: <defaults>
</compile_context>

<pallas_src>
import math
import jax
import jax.numpy as jnp
from jax.experimental import pallas as pl
from jax.experimental.pallas import tpu as pltpu

# ---- small, module-consistent config ----
B, T, D = 2, 8, 32          # batch, seq, hidden_size
H, HD   = 4, 8              # attention heads, head dim (H*HD == D)
F       = 64                # FFN intermediate dim
BOT     = 16                # adapter bottleneck dim (module default 16)
K       = 5                 # depthwise conv kernel size (odd, "same" padding)
LN_EPS  = 1e-5
BN_EPS  = 1e-5
PAD     = (K - 1) // 2

assert H * HD == D and K % 2 == 1, "config must satisfy H*HD==D and odd K"

# vecD slab row indices (all (D,)-wide per-channel vectors packed into one slab)
(I_FFN1_LN_G, I_FFN1_LN_B, I_FFN1_B2,
 I_ATTN_LN_G, I_ATTN_LN_B, I_BO,
 I_CONV_LN_G, I_CONV_LN_B,
 I_BN_G, I_BN_B, I_BN_MEAN, I_BN_VAR,
 I_FFN2_LN_G, I_FFN2_LN_B, I_FFN2_B2,
 I_AD_BU0, I_AD_BU1, I_AD_BU2,
 I_FINAL_LN_G, I_FINAL_LN_B) = range(20)
N_VECD = 20


# ---------------- in-kernel math helpers (all f32) ----------------

def _layernorm(x, g, b):
    mu = jnp.mean(x, axis=-1, keepdims=True)
    xc = x - mu
    var = jnp.mean(xc * xc, axis=-1, keepdims=True)
    return xc * jax.lax.rsqrt(var + LN_EPS) * g + b


def _silu(x):
    return x * jax.nn.sigmoid(x)


def _erf(x):
    # Abramowitz & Stegun 7.1.26, |err| < 1.5e-7 (f32 exact for our purposes).
    p = 0.3275911
    a1, a2, a3, a4, a5 = (0.254829592, -0.284496736, 1.421413741,
                          -1.453152027, 1.061405429)
    s = jnp.where(x >= 0.0, 1.0, -1.0)
    ax = jnp.abs(x)
    t = 1.0 / (1.0 + p * ax)
    poly = ((((a5 * t + a4) * t + a3) * t + a2) * t + a1) * t
    return s * (1.0 - poly * jnp.exp(-ax * ax))


def _gelu_exact(x):
    # matches torch.nn.GELU() (exact erf formulation)
    return 0.5 * x * (1.0 + _erf(x * (1.0 / math.sqrt(2.0))))


def _softmax_last(x):
    x = x - jnp.max(x, axis=-1, keepdims=True)
    e = jnp.exp(x)
    return e / jnp.sum(e, axis=-1, keepdims=True)


# ---------------- fused layer kernel ----------------

def fused_layer_kernel(x_ref, vecd_ref, vecf_ref, vecb_ref,
                       w_dff_ref, w_ffd_ref, wqkv_ref, bqkv_ref, wo3_ref,
                       w_dd_ref, dw_ref, w_down_ref, w_up_ref,
                       o_ref):
    x = x_ref[0]                                            # (T, D) f32

    def row(i):                                             # (1, D) f32 slab row
        return vecd_ref[i:i + 1, :]

    def mm(a, w):                                           # bf16 MXU feed, f32 acc
        return jnp.dot(a.astype(jnp.bfloat16), w,
                       preferred_element_type=jnp.float32)

    def bdot(a, b, contract):                               # head-batched matmul
        return jax.lax.dot_general(
            a.astype(jnp.bfloat16), b.astype(jnp.bfloat16),
            (contract, ((0,), (0,))), preferred_element_type=jnp.float32)

    # ---- FFN half-step: x + 0.5 * FFN(LN(x)) ; FFN = Linear->SiLU->Linear ----
    def ffn_block(xin, ln_g_i, ln_b_i, w1, b1, w2, b2_i):
        h = _layernorm(xin, row(ln_g_i), row(ln_b_i))
        h = mm(h, w1) + b1
        h = _silu(h)
        h = mm(h, w2) + row(b2_i)
        return xin + 0.5 * h

    # ---- adapter: x + up(GELU(down(x))) ----
    def adapter_block(xin, idx):
        h = mm(xin, w_down_ref[idx]) + vecb_ref[idx:idx + 1, :]
        h = _gelu_exact(h)
        h = mm(h, w_up_ref[idx]) + row(I_AD_BU0 + idx)
        return xin + h

    # ---------------- ffn1 + adapter ----------------
    x = ffn_block(x, I_FFN1_LN_G, I_FFN1_LN_B,
                  w_dff_ref[0], vecf_ref[0:1, :], w_ffd_ref[0], I_FFN1_B2)
    x = adapter_block(x, 0)

    # ---------------- multi-head self-attention ----------------
    # TODO(synk): attention_mask / relative & rotary position embeddings are
    # only supported as None (plain scaled dot-product MHA).
    h = _layernorm(x, row(I_ATTN_LN_G), row(I_ATTN_LN_B))
    hb = jnp.broadcast_to(h, (3 * H, T, D))                 # replicate over q/k/v heads
    qkv = bdot(hb, wqkv_ref[...], ((2,), (1,))) + bqkv_ref[...]   # (3H, T, HD)
    q, k, v = qkv[0:H], qkv[H:2 * H], qkv[2 * H:3 * H]      # leading-dim slices
    s = bdot(q, k, ((2,), (2,))) * (1.0 / math.sqrt(HD))    # (H, T, T)
    p = _softmax_last(s)
    ctx = bdot(p, v, ((2,), (1,)))                          # (H, T, HD)
    attn = bdot(ctx, wo3_ref[...], ((2,), (1,)))            # (H, T, D) per-head out-proj
    x = x + jnp.sum(attn, axis=0) + row(I_BO)
    x = adapter_block(x, 1)

    # ---------------- convolution module ----------------
    h = _layernorm(x, row(I_CONV_LN_G), row(I_CONV_LN_B))
    h16 = h.astype(jnp.bfloat16)
    a = jnp.dot(h16, w_dd_ref[0], preferred_element_type=jnp.float32)   # value half
    g = jnp.dot(h16, w_dd_ref[1], preferred_element_type=jnp.float32)   # gate half
    h = a * jax.nn.sigmoid(g)                                           # GLU
    # depthwise conv over time, "same" zero padding, fully register-resident:
    # zero-pad along time in-register and accumulate the K static tap slices.
    zpad = jnp.zeros((PAD, D), jnp.float32)
    hp = jnp.concatenate([zpad, h, zpad], axis=0)                       # (T+K-1, D)
    dw = dw_ref[...]                                                    # (K, D)
    acc = hp[0:T, :] * dw[0:1, :]
    for kk in range(1, K):                                              # static taps
        acc = acc + hp[kk:kk + T, :] * dw[kk:kk + 1, :]
    # BatchNorm (inference / running stats), SiLU, pointwise conv 2, residual
    h = (acc - row(I_BN_MEAN)) * jax.lax.rsqrt(row(I_BN_VAR) + BN_EPS)
    h = h * row(I_BN_G) + row(I_BN_B)
    h = _silu(h)
    x = x + mm(h, w_dd_ref[2])

    # ---------------- ffn2 + adapter + final LN ----------------
    x = ffn_block(x, I_FFN2_LN_G, I_FFN2_LN_B,
                  w_dff_ref[1], vecf_ref[1:2, :], w_ffd_ref[1], I_FFN2_B2)
    x = adapter_block(x, 2)
    o_ref[0] = _layernorm(x, row(I_FINAL_LN_G), row(I_FINAL_LN_B))


# ---------------- pallas_call glue ----------------

_WEIGHT_ORDER = ["vecD", "vecF", "vecB", "w_dff", "w_ffd", "wqkv", "bqkv",
                 "wo3", "w_dd", "dw", "w_down", "w_up"]


def conformer_adapter_forward(hidden_states, params, attention_mask=None,
                              relative_position_embeddings=None,
                              output_attentions=False):
    # TODO(synk): attention_mask / relative_position_embeddings supported only
    # as None; output_attentions=True path (returning attn weights) not built.
    weights = [params[name] for name in _WEIGHT_ORDER]
    in_specs = [pl.BlockSpec((1, T, D), lambda b: (b, 0, 0))]
    for w in weights:
        # weights use full-array blocks with a constant index_map -> DMA'd once
        # and kept resident across the (parallel) batch grid.
        in_specs.append(
            pl.BlockSpec(w.shape, (lambda nd: (lambda b: (0,) * nd))(w.ndim)))
    out = pl.pallas_call(
        fused_layer_kernel,
        grid=(B,),
        in_specs=in_specs,
        out_specs=pl.BlockSpec((1, T, D), lambda b: (b, 0, 0)),
        out_shape=jax.ShapeDtypeStruct((B, T, D), jnp.float32),
        compiler_params=pltpu.CompilerParams(
            dimension_semantics=("parallel",)),
    )(hidden_states, *weights)
    return out, None


# ---------------- deterministic parameter init (packed slabs) ----------------

def init_params(key):
    def lin_w(k, fan_in, fan_out):
        bound = 1.0 / math.sqrt(fan_in)        # kaiming-uniform-style bound
        return jax.random.uniform(k, (fan_in, fan_out), jnp.float32, -bound, bound)

    def lin_b(k, fan_in, n):
        bound = 1.0 / math.sqrt(fan_in)
        return jax.random.uniform(k, (n,), jnp.float32, -bound, bound)

    ks = iter(jax.random.split(key, 24))
    ones_d = jnp.ones((D,), jnp.float32)
    zeros_d = jnp.zeros((D,), jnp.float32)

    # FFN blocks (LayerNorm + Linear(D,F) + SiLU + Linear(F,D))
    ffn1_w1, ffn1_b1 = lin_w(next(ks), D, F), lin_b(next(ks), D, F)
    ffn1_w2, ffn1_b2 = lin_w(next(ks), F, D), lin_b(next(ks), F, D)
    ffn2_w1, ffn2_b1 = lin_w(next(ks), D, F), lin_b(next(ks), D, F)
    ffn2_w2, ffn2_b2 = lin_w(next(ks), F, D), lin_b(next(ks), F, D)

    # self-attention projections
    wq, bq = lin_w(next(ks), D, D), lin_b(next(ks), D, D)
    wk, bk = lin_w(next(ks), D, D), lin_b(next(ks), D, D)
    wv, bv = lin_w(next(ks), D, D), lin_b(next(ks), D, D)
    wo, bo = lin_w(next(ks), D, D), lin_b(next(ks), D, D)

    # conv module (HF conformer conv module Conv1d layers have no bias)
    pw1 = lin_w(next(ks), D, 2 * D)
    dw = jax.random.uniform(next(ks), (K, D), jnp.float32,
                            -1.0 / math.sqrt(K), 1.0 / math.sqrt(K))
    pw2 = lin_w(next(ks), D, D)

    # adapters: down weight random, up weight & all adapter biases zero (per module)
    ad_down = [lin_w(next(ks), D, BOT) for _ in range(3)]

    def heads_in(w):      # (D, D) -> (H, D, HD): per-head input projection
        return w.reshape(D, H, HD).transpose(1, 0, 2)

    wqkv = jnp.concatenate([heads_in(wq), heads_in(wk), heads_in(wv)],
                           axis=0).astype(jnp.bfloat16)                # (3H, D, HD)
    bqkv = jnp.concatenate([bq.reshape(H, 1, HD), bk.reshape(H, 1, HD),
                            bv.reshape(H, 1, HD)],
                           axis=0).astype(jnp.float32)                 # (3H, 1, HD)
    wo3 = wo.reshape(H, HD, D).astype(jnp.bfloat16)                    # (H, HD, D)

    vecD = jnp.stack([
        ones_d, zeros_d, ffn1_b2,            # ffn1 LN gamma/beta, ffn1 out bias
        ones_d, zeros_d, bo,                 # attn LN gamma/beta, out-proj bias
        ones_d, zeros_d,                     # conv LN gamma/beta
        ones_d, zeros_d, zeros_d, ones_d,    # BN gamma/beta/mean/var (eval stats)
        ones_d, zeros_d, ffn2_b2,            # ffn2 LN gamma/beta, ffn2 out bias
        zeros_d, zeros_d, zeros_d,           # adapter up biases (zero init)
        ones_d, zeros_d,                     # final LN gamma/beta
    ], axis=0)                                                          # (N_VECD, D)
    assert vecD.shape == (N_VECD, D)

    return dict(
        vecD=vecD,
        vecF=jnp.stack([ffn1_b1, ffn2_b1], axis=0),                     # (2, F)
        vecB=jnp.zeros((3, BOT), jnp.float32),                          # adapter down biases
        w_dff=jnp.stack([ffn1_w1, ffn2_w1], axis=0).astype(jnp.bfloat16),
        w_ffd=jnp.stack([ffn1_w2, ffn2_w2], axis=0).astype(jnp.bfloat16),
        wqkv=wqkv, bqkv=bqkv, wo3=wo3,
        w_dd=jnp.stack([pw1[:, :D], pw1[:, D:], pw2],
                       axis=0).astype(jnp.bfloat16),                    # GLU a/g + pw2
        dw=dw,
        w_down=jnp.stack(ad_down, axis=0).astype(jnp.bfloat16),         # (3, D, BOT)
        w_up=jnp.zeros((3, BOT, D), jnp.bfloat16),                      # zero init per module
    )


if __name__ == "__main__":
    key = jax.random.PRNGKey(0)
    k_x, k_p = jax.random.split(key)
    params = init_params(k_p)
    hidden_states = jax.random.normal(k_x, (B, T, D), jnp.float32)

    fwd = jax.jit(lambda x: conformer_adapter_forward(x, params))
    out, attn_w = fwd(hidden_states)
    jax.block_until_ready(out)
    assert out.shape == (B, T, D)
    assert attn_w is None
    assert bool(jnp.all(jnp.isfinite(out)))
    print("KERNEL_OK")
</pallas_src>

<mosaic_0001>
module attributes {stable_mosaic.version = 11 : i64} {
  func.func @fused_layer_kernel(%arg0: i32, %arg1: memref<1x8x32xf32, #tpu.memory_space<vmem>>, %arg2: memref<20x32xf32, #tpu.memory_space<vmem>>, %arg3: memref<2x64xf32, #tpu.memory_space<vmem>>, %arg4: memref<3x16xf32, #tpu.memory_space<vmem>>, %arg5: memref<2x32x64xbf16, #tpu.memory_space<vmem>>, %arg6: memref<2x64x32xbf16, #tpu.memory_space<vmem>>, %arg7: memref<12x32x8xbf16, #tpu.memory_space<vmem>>, %arg8: memref<12x1x8xf32, #tpu.memory_space<vmem>>, %arg9: memref<4x8x32xbf16, #tpu.memory_space<vmem>>, %arg10: memref<3x32x32xbf16, #tpu.memory_space<vmem>>, %arg11: memref<5x32xf32, #tpu.memory_space<vmem>>, %arg12: memref<3x32x16xbf16, #tpu.memory_space<vmem>>, %arg13: memref<3x16x32xbf16, #tpu.memory_space<vmem>>, %arg14: memref<1x8x32xf32, #tpu.memory_space<vmem>>) attributes {dimension_semantics = [#tpu.dimension_semantics<parallel>], iteration_bounds = array<i64: 2>, scalar_prefetch = 0 : i64, scratch_operands = 0 : i64, tpu.core_type = #tpu.core_type<tc>, window_params = [{transform_indices = @transform_0, window_bounds = array<i64: 1, 8, 32>}, {pipeline_mode = #tpu.pipeline_mode<synchronous>, transform_indices = @transform_1, window_bounds = array<i64: 20, 32>}, {pipeline_mode = #tpu.pipeline_mode<synchronous>, transform_indices = @transform_2, window_bounds = array<i64: 2, 64>}, {pipeline_mode = #tpu.pipeline_mode<synchronous>, transform_indices = @transform_3, window_bounds = array<i64: 3, 16>}, {pipeline_mode = #tpu.pipeline_mode<synchronous>, transform_indices = @transform_4, window_bounds = array<i64: 2, 32, 64>}, {pipeline_mode = #tpu.pipeline_mode<synchronous>, transform_indices = @transform_5, window_bounds = array<i64: 2, 64, 32>}, {pipeline_mode = #tpu.pipeline_mode<synchronous>, transform_indices = @transform_6, window_bounds = array<i64: 12, 32, 8>}, {pipeline_mode = #tpu.pipeline_mode<synchronous>, transform_indices = @transform_7, window_bounds = array<i64: 12, 1, 8>}, {pipeline_mode = #tpu.pipeline_mode<synchronous>, transform_indices = @transform_8, window_bounds = array<i64: 4, 8, 32>}, {pipeline_mode = #tpu.pipeline_mode<synchronous>, transform_indices = @transform_9, window_bounds = array<i64: 3, 32, 32>}, {pipeline_mode = #tpu.pipeline_mode<synchronous>, transform_indices = @transform_10, window_bounds = array<i64: 5, 32>}, {pipeline_mode = #tpu.pipeline_mode<synchronous>, transform_indices = @transform_11, window_bounds = array<i64: 3, 32, 16>}, {pipeline_mode = #tpu.pipeline_mode<synchronous>, transform_indices = @transform_12, window_bounds = array<i64: 3, 16, 32>}, {transform_indices = @transform_13, window_bounds = array<i64: 1, 8, 32>}]} {
    %c0 = arith.constant 0 : index
    %c0_0 = arith.constant 0 : index
    %c0_1 = arith.constant 0 : index
    %0 = vector.load %arg1[%c0, %c0_0, %c0_1] : memref<1x8x32xf32, #tpu.memory_space<vmem>>, vector<1x8x32xf32>
    %1 = vector.shape_cast %0 : vector<1x8x32xf32> to vector<8x32xf32>
    %c0_2 = arith.constant 0 : index
    %c0_3 = arith.constant 0 : index
    %c0_4 = arith.constant 0 : index
    %2 = vector.load %arg5[%c0_2, %c0_3, %c0_4] : memref<2x32x64xbf16, #tpu.memory_space<vmem>>, vector<1x32x64xbf16>
    %3 = vector.shape_cast %2 : vector<1x32x64xbf16> to vector<32x64xbf16>
    %c0_5 = arith.constant 0 : index
    %c0_6 = arith.constant 0 : index
    %4 = vector.load %arg3[%c0_5, %c0_6] : memref<2x64xf32, #tpu.memory_space<vmem>>, vector<1x64xf32>
    %c0_7 = arith.constant 0 : index
    %c0_8 = arith.constant 0 : index
    %c0_9 = arith.constant 0 : index
    %5 = vector.load %arg6[%c0_7, %c0_8, %c0_9] : memref<2x64x32xbf16, #tpu.memory_space<vmem>>, vector<1x64x32xbf16>
    %6 = vector.shape_cast %5 : vector<1x64x32xbf16> to vector<64x32xbf16>
    %c0_10 = arith.constant 0 : index
    %c0_11 = arith.constant 0 : index
    %7 = vector.load %arg2[%c0_10, %c0_11] : memref<20x32xf32, #tpu.memory_space<vmem>>, vector<1x32xf32>
    %c1 = arith.constant 1 : index
    %c0_12 = arith.constant 0 : index
    %8 = vector.load %arg2[%c1, %c0_12] : memref<20x32xf32, #tpu.memory_space<vmem>>, vector<1x32xf32>
    %cst = arith.constant dense<0.000000e+00> : vector<8xf32>
    %9 = vector.multi_reduction <add>, %1, %cst [1] : vector<8x32xf32> to vector<8xf32>
    %10 = vector.shape_cast %9 : vector<8xf32> to vector<8x1xf32>
    %cst_13 = arith.constant 3.200000e+01 : f32
    %11 = vector.broadcast %cst_13 : f32 to vector<8x1xf32>
    %12 = arith.divf %10, %11 : vector<8x1xf32>
    %13 = vector.broadcast %12 : vector<8x1xf32> to vector<8x32xf32>
    %14 = arith.subf %1, %13 : vector<8x32xf32>
    %15 = arith.mulf %14, %14 : vector<8x32xf32>
    %cst_14 = arith.constant dense<0.000000e+00> : vector<8xf32>
    %16 = vector.multi_reduction <add>, %15, %cst_14 [1] : vector<8x32xf32> to vector<8xf32>
    %17 = vector.shape_cast %16 : vector<8xf32> to vector<8x1xf32>
    %cst_15 = arith.constant 3.200000e+01 : f32
    %18 = vector.broadcast %cst_15 : f32 to vector<8x1xf32>
    %19 = arith.divf %17, %18 : vector<8x1xf32>
    %cst_16 = arith.constant 9.99999974E-6 : f32
    %20 = vector.broadcast %cst_16 : f32 to vector<8x1xf32>
    %21 = arith.addf %19, %20 : vector<8x1xf32>
    %22 = math.rsqrt %21 : vector<8x1xf32>
    %23 = vector.broadcast %22 : vector<8x1xf32> to vector<8x32xf32>
    %24 = arith.mulf %14, %23 : vector<8x32xf32>
    %25 = vector.broadcast %7 : vector<1x32xf32> to vector<8x32xf32>
    %26 = arith.mulf %24, %25 : vector<8x32xf32>
    %27 = vector.broadcast %8 : vector<1x32xf32> to vector<8x32xf32>
    %28 = arith.addf %26, %27 : vector<8x32xf32>
    %29 = arith.truncf %28 : vector<8x32xf32> to vector<8x32xbf16>
    %cst_17 = arith.constant dense<0.000000e+00> : vector<8x64xf32>
    %30 = tpu.matmul %29, %3, %cst_17 {dimension_numbers = #tpu.dot_dimension_numbers<[1], [0], [0], [1], [0, 0, 1, 1], [], []>} : vector<8x32xbf16>, vector<32x64xbf16>, vector<8x64xf32> -> vector<8x64xf32>
    %31 = vector.broadcast %4 : vector<1x64xf32> to vector<8x64xf32>
    %32 = arith.addf %30, %31 : vector<8x64xf32>
    %33 = arith.negf %32 : vector<8x64xf32>
    %34 = math.exp %33 : vector<8x64xf32>
    %cst_18 = arith.constant 1.000000e+00 : f32
    %35 = vector.broadcast %cst_18 : f32 to vector<8x64xf32>
    %36 = arith.addf %35, %34 : vector<8x64xf32>
    %37 = arith.divf %35, %36 : vector<8x64xf32>
    %38 = arith.mulf %32, %37 : vector<8x64xf32>
    %39 = arith.truncf %38 : vector<8x64xf32> to vector<8x64xbf16>
    %cst_19 = arith.constant dense<0.000000e+00> : vector<8x32xf32>
    %40 = tpu.matmul %39, %6, %cst_19 {dimension_numbers = #tpu.dot_dimension_numbers<[1], [0], [0], [1], [0, 0, 1, 1], [], []>} : vector<8x64xbf16>, vector<64x32xbf16>, vector<8x32xf32> -> vector<8x32xf32>
    %c2 = arith.constant 2 : index
    %c0_20 = arith.constant 0 : index
    %41 = vector.load %arg2[%c2, %c0_20] : memref<20x32xf32, #tpu.memory_space<vmem>>, vector<1x32xf32>
    %42 = vector.broadcast %41 : vector<1x32xf32> to vector<8x32xf32>
    %43 = arith.addf %40, %42 : vector<8x32xf32>
    %cst_21 = arith.constant 5.000000e-01 : f32
    %44 = vector.broadcast %cst_21 : f32 to vector<8x32xf32>
    %45 = arith.mulf %44, %43 : vector<8x32xf32>
    %46 = arith.addf %1, %45 : vector<8x32xf32>
    %c0_22 = arith.constant 0 : index
    %c0_23 = arith.constant 0 : index
    %c0_24 = arith.constant 0 : index
    %47 = vector.load %arg12[%c0_22, %c0_23, %c0_24] : memref<3x32x16xbf16, #tpu.memory_space<vmem>>, vector<1x32x16xbf16>
    %48 = vector.shape_cast %47 : vector<1x32x16xbf16> to vector<32x16xbf16>
    %49 = arith.truncf %46 : vector<8x32xf32> to vector<8x32xbf16>
    %cst_25 = arith.constant dense<0.000000e+00> : vector<8x16xf32>
    %50 = tpu.matmul %49, %48, %cst_25 {dimension_numbers = #tpu.dot_dimension_numbers<[1], [0], [0], [1], [0, 0, 1, 1], [], []>} : vector<8x32xbf16>, vector<32x16xbf16>, vector<8x16xf32> -> vector<8x16xf32>
    %c0_26 = arith.constant 0 : index
    %c0_27 = arith.constant 0 : index
    %51 = vector.load %arg4[%c0_26, %c0_27] : memref<3x16xf32, #tpu.memory_space<vmem>>, vector<1x16xf32>
    %52 = vector.broadcast %51 : vector<1x16xf32> to vector<8x16xf32>
    %53 = arith.addf %50, %52 : vector<8x16xf32>
    %cst_28 = arith.constant 5.000000e-01 : f32
    %54 = vector.broadcast %cst_28 : f32 to vector<8x16xf32>
    %55 = arith.mulf %54, %53 : vector<8x16xf32>
    %cst_29 = arith.constant 0.707106769 : f32
    %56 = vector.broadcast %cst_29 : f32 to vector<8x16xf32>
    %57 = arith.mulf %53, %56 : vector<8x16xf32>
    %cst_30 = arith.constant 0.000000e+00 : f32
    %58 = vector.broadcast %cst_30 : f32 to vector<8x16xf32>
    %59 = arith.cmpf oge, %57, %58 : vector<8x16xf32>
    %cst_31 = arith.constant 1.000000e+00 : f32
    %cst_32 = arith.constant -1.000000e+00 : f32
    %60 = vector.broadcast %cst_31 : f32 to vector<8x16xf32>
    %61 = vector.broadcast %cst_32 : f32 to vector<8x16xf32>
    %62 = arith.select %59, %60, %61 : vector<8x16xi1>, vector<8x16xf32>
    %63 = math.absf %57 : vector<8x16xf32>
    %cst_33 = arith.constant 0.327591091 : f32
    %64 = vector.broadcast %cst_33 : f32 to vector<8x16xf32>
    %65 = arith.mulf %64, %63 : vector<8x16xf32>
    %cst_34 = arith.constant 1.000000e+00 : f32
    %66 = vector.broadcast %cst_34 : f32 to vector<8x16xf32>
    %67 = arith.addf %66, %65 : vector<8x16xf32>
    %cst_35 = arith.constant 1.000000e+00 : f32
    %68 = vector.broadcast %cst_35 : f32 to vector<8x16xf32>
    %69 = arith.divf %68, %67 : vector<8x16xf32>
    %cst_36 = arith.constant 1.06140542 : f32
    %70 = vector.broadcast %cst_36 : f32 to vector<8x16xf32>
    %71 = arith.mulf %70, %69 : vector<8x16xf32>
    %cst_37 = arith.constant -1.45315206 : f32
    %72 = vector.broadcast %cst_37 : f32 to vector<8x16xf32>
    %73 = arith.addf %71, %72 : vector<8x16xf32>
    %74 = arith.mulf %73, %69 : vector<8x16xf32>
    %cst_38 = arith.constant 1.42141378 : f32
    %75 = vector.broadcast %cst_38 : f32 to vector<8x16xf32>
    %76 = arith.addf %74, %75 : vector<8x16xf32>
    %77 = arith.mulf %76, %69 : vector<8x16xf32>
    %cst_39 = arith.constant -0.284496725 : f32
    %78 = vector.broadcast %cst_39 : f32 to vector<8x16xf32>
    %79 = arith.addf %77, %78 : vector<8x16xf32>
    %80 = arith.mulf %79, %69 : vector<8x16xf32>
    %cst_40 = arith.constant 0.254829586 : f32
    %81 = vector.broadcast %cst_40 : f32 to vector<8x16xf32>
    %82 = arith.addf %80, %81 : vector<8x16xf32>
    %83 = arith.mulf %82, %69 : vector<8x16xf32>
    %cst_41 = arith.constant 0.000000e+00 : f32
    %84 = vector.broadcast %cst_41 : f32 to vector<8x16xf32>
    %85 = arith.subf %84, %63 : vector<8x16xf32>
    %86 = arith.mulf %85, %63 : vector<8x16xf32>
    %87 = math.exp %86 : vector<8x16xf32>
    %88 = arith.mulf %83, %87 : vector<8x16xf32>
    %cst_42 = arith.constant 1.000000e+00 : f32
    %89 = vector.broadcast %cst_42 : f32 to vector<8x16xf32>
    %90 = arith.subf %89, %88 : vector<8x16xf32>
    %91 = arith.mulf %62, %90 : vector<8x16xf32>
    %cst_43 = arith.constant 1.000000e+00 : f32
    %92 = vector.broadcast %cst_43 : f32 to vector<8x16xf32>
    %93 = arith.addf %92, %91 : vector<8x16xf32>
    %94 = arith.mulf %55, %93 : vector<8x16xf32>
    %c0_44 = arith.constant 0 : index
    %c0_45 = arith.constant 0 : index
    %c0_46 = arith.constant 0 : index
    %95 = vector.load %arg13[%c0_44, %c0_45, %c0_46] : memref<3x16x32xbf16, #tpu.memory_space<vmem>>, vector<1x16x32xbf16>
    %96 = vector.shape_cast %95 : vector<1x16x32xbf16> to vector<16x32xbf16>
    %97 = arith.truncf %94 : vector<8x16xf32> to vector<8x16xbf16>
    %cst_47 = arith.constant dense<0.000000e+00> : vector<8x32xf32>
    %98 = tpu.matmul %97, %96, %cst_47 {dimension_numbers = #tpu.dot_dimension_numbers<[1], [0], [0], [1], [0, 0, 1, 1], [], []>} : vector<8x16xbf16>, vector<16x32xbf16>, vector<8x32xf32> -> vector<8x32xf32>
    %c15 = arith.constant 15 : index
    %c0_48 = arith.constant 0 : index
    %99 = vector.load %arg2[%c15, %c0_48] : memref<20x32xf32, #tpu.memory_space<vmem>>, vector<1x32xf32>
    %100 = vector.broadcast %99 : vector<1x32xf32> to vector<8x32xf32>
    %101 = arith.addf %98, %100 : vector<8x32xf32>
    %102 = arith.addf %46, %101 : vector<8x32xf32>
    %c3 = arith.constant 3 : index
    %c0_49 = arith.constant 0 : index
    %103 = vector.load %arg2[%c3, %c0_49] : memref<20x32xf32, #tpu.memory_space<vmem>>, vector<1x32xf32>
    %c4 = arith.constant 4 : index
    %c0_50 = arith.constant 0 : index
    %104 = vector.load %arg2[%c4, %c0_50] : memref<20x32xf32, #tpu.memory_space<vmem>>, vector<1x32xf32>
    %cst_51 = arith.constant dense<0.000000e+00> : vector<8xf32>
    %105 = vector.multi_reduction <add>, %102, %cst_51 [1] : vector<8x32xf32> to vector<8xf32>
    %106 = vector.shape_cast %105 : vector<8xf32> to vector<8x1xf32>
    %cst_52 = arith.constant 3.200000e+01 : f32
    %107 = vector.broadcast %cst_52 : f32 to vector<8x1xf32>
    %108 = arith.divf %106, %107 : vector<8x1xf32>
    %109 = vector.broadcast %108 : vector<8x1xf32> to vector<8x32xf32>
    %110 = arith.subf %102, %109 : vector<8x32xf32>
    %111 = arith.mulf %110, %110 : vector<8x32xf32>
    %cst_53 = arith.constant dense<0.000000e+00> : vector<8xf32>
    %112 = vector.multi_reduction <add>, %111, %cst_53 [1] : vector<8x32xf32> to vector<8xf32>
    %113 = vector.shape_cast %112 : vector<8xf32> to vector<8x1xf32>
    %cst_54 = arith.constant 3.200000e+01 : f32
    %114 = vector.broadcast %cst_54 : f32 to vector<8x1xf32>
    %115 = arith.divf %113, %114 : vector<8x1xf32>
    %cst_55 = arith.constant 9.99999974E-6 : f32
    %116 = vector.broadcast %cst_55 : f32 to vector<8x1xf32>
    %117 = arith.addf %115, %116 : vector<8x1xf32>
    %118 = math.rsqrt %117 : vector<8x1xf32>
    %119 = vector.broadcast %118 : vector<8x1xf32> to vector<8x32xf32>
    %120 = arith.mulf %110, %119 : vector<8x32xf32>
    %121 = vector.broadcast %103 : vector<1x32xf32> to vector<8x32xf32>
    %122 = arith.mulf %120, %121 : vector<8x32xf32>
    %123 = vector.broadcast %104 : vector<1x32xf32> to vector<8x32xf32>
    %124 = arith.addf %122, %123 : vector<8x32xf32>
    %125 = vector.shape_cast %124 : vector<8x32xf32> to vector<1x8x32xf32>
    %126 = vector.broadcast %125 : vector<1x8x32xf32> to vector<12x8x32xf32>
    %c0_56 = arith.constant 0 : index
    %c0_57 = arith.constant 0 : index
    %c0_58 = arith.constant 0 : index
    %127 = vector.load %arg7[%c0_56, %c0_57, %c0_58] : memref<12x32x8xbf16, #tpu.memory_space<vmem>>, vector<12x32x8xbf16>
    %128 = arith.truncf %126 : vector<12x8x32xf32> to vector<12x8x32xbf16>
    %cst_59 = arith.constant dense<0.000000e+00> : vector<12x8x8xf32>
    %129 = tpu.matmul %128, %127, %cst_59 {dimension_numbers = #tpu.dot_dimension_numbers<[2], [1], [1], [2], [0, 0, 0, 1, 1, 2], [0], [0]>} : vector<12x8x32xbf16>, vector<12x32x8xbf16>, vector<12x8x8xf32> -> vector<12x8x8xf32>
    %c0_60 = arith.constant 0 : index
    %c0_61 = arith.constant 0 : index
    %c0_62 = arith.constant 0 : index
    %130 = vector.load %arg8[%c0_60, %c0_61, %c0_62] : memref<12x1x8xf32, #tpu.memory_space<vmem>>, vector<12x1x8xf32>
    %131 = vector.broadcast %130 : vector<12x1x8xf32> to vector<12x8x8xf32>
    %132 = arith.addf %129, %131 : vector<12x8x8xf32>
    %133 = vector.extract_strided_slice %132 {offsets = [0, 0, 0], sizes = [4, 8, 8], strides = [1, 1, 1]} : vector<12x8x8xf32> to vector<4x8x8xf32>
    %134 = vector.extract_strided_slice %132 {offsets = [4, 0, 0], sizes = [4, 8, 8], strides = [1, 1, 1]} : vector<12x8x8xf32> to vector<4x8x8xf32>
    %135 = vector.extract_strided_slice %132 {offsets = [8, 0, 0], sizes = [4, 8, 8], strides = [1, 1, 1]} : vector<12x8x8xf32> to vector<4x8x8xf32>
    %136 = arith.truncf %133 : vector<4x8x8xf32> to vector<4x8x8xbf16>
    %137 = arith.truncf %134 : vector<4x8x8xf32> to vector<4x8x8xbf16>
    %cst_63 = arith.constant dense<0.000000e+00> : vector<4x8x8xf32>
    %138 = tpu.matmul %136, %137, %cst_63 {dimension_numbers = #tpu.dot_dimension_numbers<[2], [2], [1], [1], [0, 0, 0, 1, 1, 1], [0], [0]>} : vector<4x8x8xbf16>, vector<4x8x8xbf16>, vector<4x8x8xf32> -> vector<4x8x8xf32>
    %cst_64 = arith.constant 0.353553385 : f32
    %139 = vector.broadcast %cst_64 : f32 to vector<4x8x8xf32>
    %140 = arith.mulf %138, %139 : vector<4x8x8xf32>
    %cst_65 = arith.constant dense<0xFF800000> : vector<4x8xf32>
    %141 = vector.multi_reduction <maximumf>, %140, %cst_65 [2] : vector<4x8x8xf32> to vector<4x8xf32>
    %142 = vector.shape_cast %141 : vector<4x8xf32> to vector<4x8x1xf32>
    %143 = vector.broadcast %142 : vector<4x8x1xf32> to vector<4x8x8xf32>
    %144 = arith.subf %140, %143 : vector<4x8x8xf32>
    %145 = math.exp %144 : vector<4x8x8xf32>
    %cst_66 = arith.constant dense<0.000000e+00> : vector<4x8xf32>
    %146 = vector.multi_reduction <add>, %145, %cst_66 [2] : vector<4x8x8xf32> to vector<4x8xf32>
    %147 = vector.shape_cast %146 : vector<4x8xf32> to vector<4x8x1xf32>
    %148 = vector.broadcast %147 : vector<4x8x1xf32> to vector<4x8x8xf32>
    %149 = arith.divf %145, %148 : vector<4x8x8xf32>
    %150 = arith.truncf %149 : vector<4x8x8xf32> to vector<4x8x8xbf16>
    %151 = arith.truncf %135 : vector<4x8x8xf32> to vector<4x8x8xbf16>
    %cst_67 = arith.constant dense<0.000000e+00> : vector<4x8x8xf32>
    %152 = tpu.matmul %150, %151, %cst_67 {dimension_numbers = #tpu.dot_dimension_numbers<[2], [1], [1], [2], [0, 0, 0, 1, 1, 2], [0], [0]>} : vector<4x8x8xbf16>, vector<4x8x8xbf16>, vector<4x8x8xf32> -> vector<4x8x8xf32>
    %c0_68 = arith.constant 0 : index
    %c0_69 = arith.constant 0 : index
    %c0_70 = arith.constant 0 : index
    %153 = vector.load %arg9[%c0_68, %c0_69, %c0_70] : memref<4x8x32xbf16, #tpu.memory_space<vmem>>, vector<4x8x32xbf16>
    %154 = arith.truncf %152 : vector<4x8x8xf32> to vector<4x8x8xbf16>
    %cst_71 = arith.constant dense<0.000000e+00> : vector<4x8x32xf32>
    %155 = tpu.matmul %154, %153, %cst_71 {dimension_numbers = #tpu.dot_dimension_numbers<[2], [1], [1], [2], [0, 0, 0, 1, 1, 2], [0], [0]>} : vector<4x8x8xbf16>, vector<4x8x32xbf16>, vector<4x8x32xf32> -> vector<4x8x32xf32>
    %cst_72 = arith.constant dense<0.000000e+00> : vector<8x32xf32>
    %156 = vector.multi_reduction <add>, %155, %cst_72 [0] : vector<4x8x32xf32> to vector<8x32xf32>
    %157 = arith.addf %102, %156 : vector<8x32xf32>
    %c5 = arith.constant 5 : index
    %c0_73 = arith.constant 0 : index
    %158 = vector.load %arg2[%c5, %c0_73] : memref<20x32xf32, #tpu.memory_space<vmem>>, vector<1x32xf32>
    %159 = vector.broadcast %158 : vector<1x32xf32> to vector<8x32xf32>
    %160 = arith.addf %157, %159 : vector<8x32xf32>
    %c1_74 = arith.constant 1 : index
    %c0_75 = arith.constant 0 : index
    %c0_76 = arith.constant 0 : index
    %161 = vector.load %arg12[%c1_74, %c0_75, %c0_76] : memref<3x32x16xbf16, #tpu.memory_space<vmem>>, vector<1x32x16xbf16>
    %162 = vector.shape_cast %161 : vector<1x32x16xbf16> to vector<32x16xbf16>
    %163 = arith.truncf %160 : vector<8x32xf32> to vector<8x32xbf16>
    %cst_77 = arith.constant dense<0.000000e+00> : vector<8x16xf32>
    %164 = tpu.matmul %163, %162, %cst_77 {dimension_numbers = #tpu.dot_dimension_numbers<[1], [0], [0], [1], [0, 0, 1, 1], [], []>} : vector<8x32xbf16>, vector<32x16xbf16>, vector<8x16xf32> -> vector<8x16xf32>
    %c1_78 = arith.constant 1 : index
    %c0_79 = arith.constant 0 : index
    %165 = vector.load %arg4[%c1_78, %c0_79] : memref<3x16xf32, #tpu.memory_space<vmem>>, vector<1x16xf32>
    %166 = vector.broadcast %165 : vector<1x16xf32> to vector<8x16xf32>
    %167 = arith.addf %164, %166 : vector<8x16xf32>
    %cst_80 = arith.constant 5.000000e-01 : f32
    %168 = vector.broadcast %cst_80 : f32 to vector<8x16xf32>
    %169 = arith.mulf %168, %167 : vector<8x16xf32>
    %cst_81 = arith.constant 0.707106769 : f32
    %170 = vector.broadcast %cst_81 : f32 to vector<8x16xf32>
    %171 = arith.mulf %167, %170 : vector<8x16xf32>
    %cst_82 = arith.constant 0.000000e+00 : f32
    %172 = vector.broadcast %cst_82 : f32 to vector<8x16xf32>
    %173 = arith.cmpf oge, %171, %172 : vector<8x16xf32>
    %cst_83 = arith.constant 1.000000e+00 : f32
    %cst_84 = arith.constant -1.000000e+00 : f32
    %174 = vector.broadcast %cst_83 : f32 to vector<8x16xf32>
    %175 = vector.broadcast %cst_84 : f32 to vector<8x16xf32>
    %176 = arith.select %173, %174, %175 : vector<8x16xi1>, vector<8x16xf32>
    %177 = math.absf %171 : vector<8x16xf32>
    %cst_85 = arith.constant 0.327591091 : f32
    %178 = vector.broadcast %cst_85 : f32 to vector<8x16xf32>
    %179 = arith.mulf %178, %177 : vector<8x16xf32>
    %cst_86 = arith.constant 1.000000e+00 : f32
    %180 = vector.broadcast %cst_86 : f32 to vector<8x16xf32>
    %181 = arith.addf %180, %179 : vector<8x16xf32>
    %cst_87 = arith.constant 1.000000e+00 : f32
    %182 = vector.broadcast %cst_87 : f32 to vector<8x16xf32>
    %183 = arith.divf %182, %181 : vector<8x16xf32>
    %cst_88 = arith.constant 1.06140542 : f32
    %184 = vector.broadcast %cst_88 : f32 to vector<8x16xf32>
    %185 = arith.mulf %184, %183 : vector<8x16xf32>
    %cst_89 = arith.constant -1.45315206 : f32
    %186 = vector.broadcast %cst_89 : f32 to vector<8x16xf32>
    %187 = arith.addf %185, %186 : vector<8x16xf32>
    %188 = arith.mulf %187, %183 : vector<8x16xf32>
    %cst_90 = arith.constant 1.42141378 : f32
    %189 = vector.broadcast %cst_90 : f32 to vector<8x16xf32>
    %190 = arith.addf %188, %189 : vector<8x16xf32>
    %191 = arith.mulf %190, %183 : vector<8x16xf32>
    %cst_91 = arith.constant -0.284496725 : f32
    %192 = vector.broadcast %cst_91 : f32 to vector<8x16xf32>
    %193 = arith.addf %191, %192 : vector<8x16xf32>
    %194 = arith.mulf %193, %183 : vector<8x16xf32>
    %cst_92 = arith.constant 0.254829586 : f32
    %195 = vector.broadcast %cst_92 : f32 to vector<8x16xf32>
    %196 = arith.addf %194, %195 : vector<8x16xf32>
    %197 = arith.mulf %196, %183 : vector<8x16xf32>
    %cst_93 = arith.constant 0.000000e+00 : f32
    %198 = vector.broadcast %cst_93 : f32 to vector<8x16xf32>
    %199 = arith.subf %198, %177 : vector<8x16xf32>
    %200 = arith.mulf %199, %177 : vector<8x16xf32>
    %201 = math.exp %200 : vector<8x16xf32>
    %202 = arith.mulf %197, %201 : vector<8x16xf32>
    %cst_94 = arith.constant 1.000000e+00 : f32
    %203 = vector.broadcast %cst_94 : f32 to vector<8x16xf32>
    %204 = arith.subf %203, %202 : vector<8x16xf32>
    %205 = arith.mulf %176, %204 : vector<8x16xf32>
    %cst_95 = arith.constant 1.000000e+00 : f32
    %206 = vector.broadcast %cst_95 : f32 to vector<8x16xf32>
    %207 = arith.addf %206, %205 : vector<8x16xf32>
    %208 = arith.mulf %169, %207 : vector<8x16xf32>
    %c1_96 = arith.constant 1 : index
    %c0_97 = arith.constant 0 : index
    %c0_98 = arith.constant 0 : index
    %209 = vector.load %arg13[%c1_96, %c0_97, %c0_98] : memref<3x16x32xbf16, #tpu.memory_space<vmem>>, vector<1x16x32xbf16>
    %210 = vector.shape_cast %209 : vector<1x16x32xbf16> to vector<16x32xbf16>
    %211 = arith.truncf %208 : vector<8x16xf32> to vector<8x16xbf16>
    %cst_99 = arith.constant dense<0.000000e+00> : vector<8x32xf32>
    %212 = tpu.matmul %211, %210, %cst_99 {dimension_numbers = #tpu.dot_dimension_numbers<[1], [0], [0], [1], [0, 0, 1, 1], [], []>} : vector<8x16xbf16>, vector<16x32xbf16>, vector<8x32xf32> -> vector<8x32xf32>
    %c16 = arith.constant 16 : index
    %c0_100 = arith.constant 0 : index
    %213 = vector.load %arg2[%c16, %c0_100] : memref<20x32xf32, #tpu.memory_space<vmem>>, vector<1x32xf32>
    %214 = vector.broadcast %213 : vector<1x32xf32> to vector<8x32xf32>
    %215 = arith.addf %212, %214 : vector<8x32xf32>
    %216 = arith.addf %160, %215 : vector<8x32xf32>
    %c6 = arith.constant 6 : index
    %c0_101 = arith.constant 0 : index
    %217 = vector.load %arg2[%c6, %c0_101] : memref<20x32xf32, #tpu.memory_space<vmem>>, vector<1x32xf32>
    %c7 = arith.constant 7 : index
    %c0_102 = arith.constant 0 : index
    %218 = vector.load %arg2[%c7, %c0_102] : memref<20x32xf32, #tpu.memory_space<vmem>>, vector<1x32xf32>
    %cst_103 = arith.constant dense<0.000000e+00> : vector<8xf32>
    %219 = vector.multi_reduction <add>, %216, %cst_103 [1] : vector<8x32xf32> to vector<8xf32>
    %220 = vector.shape_cast %219 : vector<8xf32> to vector<8x1xf32>
    %cst_104 = arith.constant 3.200000e+01 : f32
    %221 = vector.broadcast %cst_104 : f32 to vector<8x1xf32>
    %222 = arith.divf %220, %221 : vector<8x1xf32>
    %223 = vector.broadcast %222 : vector<8x1xf32> to vector<8x32xf32>
    %224 = arith.subf %216, %223 : vector<8x32xf32>
    %225 = arith.mulf %224, %224 : vector<8x32xf32>
    %cst_105 = arith.constant dense<0.000000e+00> : vector<8xf32>
    %226 = vector.multi_reduction <add>, %225, %cst_105 [1] : vector<8x32xf32> to vector<8xf32>
    %227 = vector.shape_cast %226 : vector<8xf32> to vector<8x1xf32>
    %cst_106 = arith.constant 3.200000e+01 : f32
    %228 = vector.broadcast %cst_106 : f32 to vector<8x1xf32>
    %229 = arith.divf %227, %228 : vector<8x1xf32>
    %cst_107 = arith.constant 9.99999974E-6 : f32
    %230 = vector.broadcast %cst_107 : f32 to vector<8x1xf32>
    %231 = arith.addf %229, %230 : vector<8x1xf32>
    %232 = math.rsqrt %231 : vector<8x1xf32>
    %233 = vector.broadcast %232 : vector<8x1xf32> to vector<8x32xf32>
    %234 = arith.mulf %224, %233 : vector<8x32xf32>
    %235 = vector.broadcast %217 : vector<1x32xf32> to vector<8x32xf32>
    %236 = arith.mulf %234, %235 : vector<8x32xf32>
    %237 = vector.broadcast %218 : vector<1x32xf32> to vector<8x32xf32>
    %238 = arith.addf %236, %237 : vector<8x32xf32>
    %239 = arith.truncf %238 : vector<8x32xf32> to vector<8x32xbf16>
    %c0_108 = arith.constant 0 : index
    %c0_109 = arith.constant 0 : index
    %c0_110 = arith.constant 0 : index
    %240 = vector.load %arg10[%c0_108, %c0_109, %c0_110] : memref<3x32x32xbf16, #tpu.memory_space<vmem>>, vector<1x32x32xbf16>
    %241 = vector.shape_cast %240 : vector<1x32x32xbf16> to vector<32x32xbf16>
    %cst_111 = arith.constant dense<0.000000e+00> : vector<8x32xf32>
    %242 = tpu.matmul %239, %241, %cst_111 {dimension_numbers = #tpu.dot_dimension_numbers<[1], [0], [0], [1], [0, 0, 1, 1], [], []>} : vector<8x32xbf16>, vector<32x32xbf16>, vector<8x32xf32> -> vector<8x32xf32>
    %c1_112 = arith.constant 1 : index
    %c0_113 = arith.constant 0 : index
    %c0_114 = arith.constant 0 : index
    %243 = vector.load %arg10[%c1_112, %c0_113, %c0_114] : memref<3x32x32xbf16, #tpu.memory_space<vmem>>, vector<1x32x32xbf16>
    %244 = vector.shape_cast %243 : vector<1x32x32xbf16> to vector<32x32xbf16>
    %cst_115 = arith.constant dense<0.000000e+00> : vector<8x32xf32>
    %245 = tpu.matmul %239, %244, %cst_115 {dimension_numbers = #tpu.dot_dimension_numbers<[1], [0], [0], [1], [0, 0, 1, 1], [], []>} : vector<8x32xbf16>, vector<32x32xbf16>, vector<8x32xf32> -> vector<8x32xf32>
    %246 = arith.negf %245 : vector<8x32xf32>
    %247 = math.exp %246 : vector<8x32xf32>
    %cst_116 = arith.constant 1.000000e+00 : f32
    %248 = vector.broadcast %cst_116 : f32 to vector<8x32xf32>
    %249 = arith.addf %248, %247 : vector<8x32xf32>
    %250 = arith.divf %248, %249 : vector<8x32xf32>
    %251 = arith.mulf %242, %250 : vector<8x32xf32>
    %cst_117 = arith.constant 0.000000e+00 : f32
    %252 = vector.broadcast %cst_117 : f32 to vector<2x32xf32>
    %253 = tpu.concatenate %252, %251, %252 in 0 : vector<2x32xf32>, vector<8x32xf32>, vector<2x32xf32> -> vector<12x32xf32>
    %c0_118 = arith.constant 0 : index
    %c0_119 = arith.constant 0 : index
    %254 = vector.load %arg11[%c0_118, %c0_119] : memref<5x32xf32, #tpu.memory_space<vmem>>, vector<5x32xf32>
    %255 = vector.extract_strided_slice %253 {offsets = [0, 0], sizes = [8, 32], strides = [1, 1]} : vector<12x32xf32> to vector<8x32xf32>
    %256 = vector.extract_strided_slice %254 {offsets = [0, 0], sizes = [1, 32], strides = [1, 1]} : vector<5x32xf32> to vector<1x32xf32>
    %257 = vector.broadcast %256 : vector<1x32xf32> to vector<8x32xf32>
    %258 = arith.mulf %255, %257 : vector<8x32xf32>
    %259 = vector.extract_strided_slice %253 {offsets = [1, 0], sizes = [8, 32], strides = [1, 1]} : vector<12x32xf32> to vector<8x32xf32>
    %260 = vector.extract_strided_slice %254 {offsets = [1, 0], sizes = [1, 32], strides = [1, 1]} : vector<5x32xf32> to vector<1x32xf32>
    %261 = vector.broadcast %260 : vector<1x32xf32> to vector<8x32xf32>
    %262 = arith.mulf %259, %261 : vector<8x32xf32>
    %263 = arith.addf %258, %262 : vector<8x32xf32>
    %264 = vector.extract_strided_slice %253 {offsets = [2, 0], sizes = [8, 32], strides = [1, 1]} : vector<12x32xf32> to vector<8x32xf32>
    %265 = vector.extract_strided_slice %254 {offsets = [2, 0], sizes = [1, 32], strides = [1, 1]} : vector<5x32xf32> to vector<1x32xf32>
    %266 = vector.broadcast %265 : vector<1x32xf32> to vector<8x32xf32>
    %267 = arith.mulf %264, %266 : vector<8x32xf32>
    %268 = arith.addf %263, %267 : vector<8x32xf32>
    %269 = vector.extract_strided_slice %253 {offsets = [3, 0], sizes = [8, 32], strides = [1, 1]} : vector<12x32xf32> to vector<8x32xf32>
    %270 = vector.extract_strided_slice %254 {offsets = [3, 0], sizes = [1, 32], strides = [1, 1]} : vector<5x32xf32> to vector<1x32xf32>
    %271 = vector.broadcast %270 : vector<1x32xf32> to vector<8x32xf32>
    %272 = arith.mulf %269, %271 : vector<8x32xf32>
    %273 = arith.addf %268, %272 : vector<8x32xf32>
    %274 = vector.extract_strided_slice %253 {offsets = [4, 0], sizes = [8, 32], strides = [1, 1]} : vector<12x32xf32> to vector<8x32xf32>
    %275 = vector.extract_strided_slice %254 {offsets = [4, 0], sizes = [1, 32], strides = [1, 1]} : vector<5x32xf32> to vector<1x32xf32>
    %276 = vector.broadcast %275 : vector<1x32xf32> to vector<8x32xf32>
    %277 = arith.mulf %274, %276 : vector<8x32xf32>
    %278 = arith.addf %273, %277 : vector<8x32xf32>
    %c10 = arith.constant 10 : index
    %c0_120 = arith.constant 0 : index
    %279 = vector.load %arg2[%c10, %c0_120] : memref<20x32xf32, #tpu.memory_space<vmem>>, vector<1x32xf32>
    %280 = vector.broadcast %279 : vector<1x32xf32> to vector<8x32xf32>
    %281 = arith.subf %278, %280 : vector<8x32xf32>
    %c11 = arith.constant 11 : index
    %c0_121 = arith.constant 0 : index
    %282 = vector.load %arg2[%c11, %c0_121] : memref<20x32xf32, #tpu.memory_space<vmem>>, vector<1x32xf32>
    %cst_122 = arith.constant 9.99999974E-6 : f32
    %283 = vector.broadcast %cst_122 : f32 to vector<1x32xf32>
    %284 = arith.addf %282, %283 : vector<1x32xf32>
    %285 = math.rsqrt %284 : vector<1x32xf32>
    %286 = vector.broadcast %285 : vector<1x32xf32> to vector<8x32xf32>
    %287 = arith.mulf %281, %286 : vector<8x32xf32>
    %c8 = arith.constant 8 : index
    %c0_123 = arith.constant 0 : index
    %288 = vector.load %arg2[%c8, %c0_123] : memref<20x32xf32, #tpu.memory_space<vmem>>, vector<1x32xf32>
    %289 = vector.broadcast %288 : vector<1x32xf32> to vector<8x32xf32>
    %290 = arith.mulf %287, %289 : vector<8x32xf32>
    %c9 = arith.constant 9 : index
    %c0_124 = arith.constant 0 : index
    %291 = vector.load %arg2[%c9, %c0_124] : memref<20x32xf32, #tpu.memory_space<vmem>>, vector<1x32xf32>
    %292 = vector.broadcast %291 : vector<1x32xf32> to vector<8x32xf32>
    %293 = arith.addf %290, %292 : vector<8x32xf32>
    %294 = arith.negf %293 : vector<8x32xf32>
    %295 = math.exp %294 : vector<8x32xf32>
    %cst_125 = arith.constant 1.000000e+00 : f32
    %296 = vector.broadcast %cst_125 : f32 to vector<8x32xf32>
    %297 = arith.addf %296, %295 : vector<8x32xf32>
    %298 = arith.divf %296, %297 : vector<8x32xf32>
    %299 = arith.mulf %293, %298 : vector<8x32xf32>
    %c2_126 = arith.constant 2 : index
    %c0_127 = arith.constant 0 : index
    %c0_128 = arith.constant 0 : index
    %300 = vector.load %arg10[%c2_126, %c0_127, %c0_128] : memref<3x32x32xbf16, #tpu.memory_space<vmem>>, vector<1x32x32xbf16>
    %301 = vector.shape_cast %300 : vector<1x32x32xbf16> to vector<32x32xbf16>
    %302 = arith.truncf %299 : vector<8x32xf32> to vector<8x32xbf16>
    %cst_129 = arith.constant dense<0.000000e+00> : vector<8x32xf32>
    %303 = tpu.matmul %302, %301, %cst_129 {dimension_numbers = #tpu.dot_dimension_numbers<[1], [0], [0], [1], [0, 0, 1, 1], [], []>} : vector<8x32xbf16>, vector<32x32xbf16>, vector<8x32xf32> -> vector<8x32xf32>
    %304 = arith.addf %216, %303 : vector<8x32xf32>
    %c1_130 = arith.constant 1 : index
    %c0_131 = arith.constant 0 : index
    %c0_132 = arith.constant 0 : index
    %305 = vector.load %arg5[%c1_130, %c0_131, %c0_132] : memref<2x32x64xbf16, #tpu.memory_space<vmem>>, vector<1x32x64xbf16>
    %306 = vector.shape_cast %305 : vector<1x32x64xbf16> to vector<32x64xbf16>
    %c1_133 = arith.constant 1 : index
    %c0_134 = arith.constant 0 : index
    %307 = vector.load %arg3[%c1_133, %c0_134] : memref<2x64xf32, #tpu.memory_space<vmem>>, vector<1x64xf32>
    %c1_135 = arith.constant 1 : index
    %c0_136 = arith.constant 0 : index
    %c0_137 = arith.constant 0 : index
    %308 = vector.load %arg6[%c1_135, %c0_136, %c0_137] : memref<2x64x32xbf16, #tpu.memory_space<vmem>>, vector<1x64x32xbf16>
    %309 = vector.shape_cast %308 : vector<1x64x32xbf16> to vector<64x32xbf16>
    %c12 = arith.constant 12 : index
    %c0_138 = arith.constant 0 : index
    %310 = vector.load %arg2[%c12, %c0_138] : memref<20x32xf32, #tpu.memory_space<vmem>>, vector<1x32xf32>
    %c13 = arith.constant 13 : index
    %c0_139 = arith.constant 0 : index
    %311 = vector.load %arg2[%c13, %c0_139] : memref<20x32xf32, #tpu.memory_space<vmem>>, vector<1x32xf32>
    %cst_140 = arith.constant dense<0.000000e+00> : vector<8xf32>
    %312 = vector.multi_reduction <add>, %304, %cst_140 [1] : vector<8x32xf32> to vector<8xf32>
    %313 = vector.shape_cast %312 : vector<8xf32> to vector<8x1xf32>
    %cst_141 = arith.constant 3.200000e+01 : f32
    %314 = vector.broadcast %cst_141 : f32 to vector<8x1xf32>
    %315 = arith.divf %313, %314 : vector<8x1xf32>
    %316 = vector.broadcast %315 : vector<8x1xf32> to vector<8x32xf32>
    %317 = arith.subf %304, %316 : vector<8x32xf32>
    %318 = arith.mulf %317, %317 : vector<8x32xf32>
    %cst_142 = arith.constant dense<0.000000e+00> : vector<8xf32>
    %319 = vector.multi_reduction <add>, %318, %cst_142 [1] : vector<8x32xf32> to vector<8xf32>
    %320 = vector.shape_cast %319 : vector<8xf32> to vector<8x1xf32>
    %cst_143 = arith.constant 3.200000e+01 : f32
    %321 = vector.broadcast %cst_143 : f32 to vector<8x1xf32>
    %322 = arith.divf %320, %321 : vector<8x1xf32>
    %cst_144 = arith.constant 9.99999974E-6 : f32
    %323 = vector.broadcast %cst_144 : f32 to vector<8x1xf32>
    %324 = arith.addf %322, %323 : vector<8x1xf32>
    %325 = math.rsqrt %324 : vector<8x1xf32>
    %326 = vector.broadcast %325 : vector<8x1xf32> to vector<8x32xf32>
    %327 = arith.mulf %317, %326 : vector<8x32xf32>
    %328 = vector.broadcast %310 : vector<1x32xf32> to vector<8x32xf32>
    %329 = arith.mulf %327, %328 : vector<8x32xf32>
    %330 = vector.broadcast %311 : vector<1x32xf32> to vector<8x32xf32>
    %331 = arith.addf %329, %330 : vector<8x32xf32>
    %332 = arith.truncf %331 : vector<8x32xf32> to vector<8x32xbf16>
    %cst_145 = arith.constant dense<0.000000e+00> : vector<8x64xf32>
    %333 = tpu.matmul %332, %306, %cst_145 {dimension_numbers = #tpu.dot_dimension_numbers<[1], [0], [0], [1], [0, 0, 1, 1], [], []>} : vector<8x32xbf16>, vector<32x64xbf16>, vector<8x64xf32> -> vector<8x64xf32>
    %334 = vector.broadcast %307 : vector<1x64xf32> to vector<8x64xf32>
    %335 = arith.addf %333, %334 : vector<8x64xf32>
    %336 = arith.negf %335 : vector<8x64xf32>
    %337 = math.exp %336 : vector<8x64xf32>
    %cst_146 = arith.constant 1.000000e+00 : f32
    %338 = vector.broadcast %cst_146 : f32 to vector<8x64xf32>
    %339 = arith.addf %338, %337 : vector<8x64xf32>
    %340 = arith.divf %338, %339 : vector<8x64xf32>
    %341 = arith.mulf %335, %340 : vector<8x64xf32>
    %342 = arith.truncf %341 : vector<8x64xf32> to vector<8x64xbf16>
    %cst_147 = arith.constant dense<0.000000e+00> : vector<8x32xf32>
    %343 = tpu.matmul %342, %309, %cst_147 {dimension_numbers = #tpu.dot_dimension_numbers<[1], [0], [0], [1], [0, 0, 1, 1], [], []>} : vector<8x64xbf16>, vector<64x32xbf16>, vector<8x32xf32> -> vector<8x32xf32>
    %c14 = arith.constant 14 : index
    %c0_148 = arith.constant 0 : index
    %344 = vector.load %arg2[%c14, %c0_148] : memref<20x32xf32, #tpu.memory_space<vmem>>, vector<1x32xf32>
    %345 = vector.broadcast %344 : vector<1x32xf32> to vector<8x32xf32>
    %346 = arith.addf %343, %345 : vector<8x32xf32>
    %cst_149 = arith.constant 5.000000e-01 : f32
    %347 = vector.broadcast %cst_149 : f32 to vector<8x32xf32>
    %348 = arith.mulf %347, %346 : vector<8x32xf32>
    %349 = arith.addf %304, %348 : vector<8x32xf32>
    %c2_150 = arith.constant 2 : index
    %c0_151 = arith.constant 0 : index
    %c0_152 = arith.constant 0 : index
    %350 = vector.load %arg12[%c2_150, %c0_151, %c0_152] : memref<3x32x16xbf16, #tpu.memory_space<vmem>>, vector<1x32x16xbf16>
    %351 = vector.shape_cast %350 : vector<1x32x16xbf16> to vector<32x16xbf16>
    %352 = arith.truncf %349 : vector<8x32xf32> to vector<8x32xbf16>
    %cst_153 = arith.constant dense<0.000000e+00> : vector<8x16xf32>
    %353 = tpu.matmul %352, %351, %cst_153 {dimension_numbers = #tpu.dot_dimension_numbers<[1], [0], [0], [1], [0, 0, 1, 1], [], []>} : vector<8x32xbf16>, vector<32x16xbf16>, vector<8x16xf32> -> vector<8x16xf32>
    %c2_154 = arith.constant 2 : index
    %c0_155 = arith.constant 0 : index
    %354 = vector.load %arg4[%c2_154, %c0_155] : memref<3x16xf32, #tpu.memory_space<vmem>>, vector<1x16xf32>
    %355 = vector.broadcast %354 : vector<1x16xf32> to vector<8x16xf32>
    %356 = arith.addf %353, %355 : vector<8x16xf32>
    %cst_156 = arith.constant 5.000000e-01 : f32
    %357 = vector.broadcast %cst_156 : f32 to vector<8x16xf32>
    %358 = arith.mulf %357, %356 : vector<8x16xf32>
    %cst_157 = arith.constant 0.707106769 : f32
    %359 = vector.broadcast %cst_157 : f32 to vector<8x16xf32>
    %360 = arith.mulf %356, %359 : vector<8x16xf32>
    %cst_158 = arith.constant 0.000000e+00 : f32
    %361 = vector.broadcast %cst_158 : f32 to vector<8x16xf32>
    %362 = arith.cmpf oge, %360, %361 : vector<8x16xf32>
    %cst_159 = arith.constant 1.000000e+00 : f32
    %cst_160 = arith.constant -1.000000e+00 : f32
    %363 = vector.broadcast %cst_159 : f32 to vector<8x16xf32>
    %364 = vector.broadcast %cst_160 : f32 to vector<8x16xf32>
    %365 = arith.select %362, %363, %364 : vector<8x16xi1>, vector<8x16xf32>
    %366 = math.absf %360 : vector<8x16xf32>
    %cst_161 = arith.constant 0.327591091 : f32
    %367 = vector.broadcast %cst_161 : f32 to vector<8x16xf32>
    %368 = arith.mulf %367, %366 : vector<8x16xf32>
    %cst_162 = arith.constant 1.000000e+00 : f32
    %369 = vector.broadcast %cst_162 : f32 to vector<8x16xf32>
    %370 = arith.addf %369, %368 : vector<8x16xf32>
    %cst_163 = arith.constant 1.000000e+00 : f32
    %371 = vector.broadcast %cst_163 : f32 to vector<8x16xf32>
    %372 = arith.divf %371, %370 : vector<8x16xf32>
    %cst_164 = arith.constant 1.06140542 : f32
    %373 = vector.broadcast %cst_164 : f32 to vector<8x16xf32>
    %374 = arith.mulf %373, %372 : vector<8x16xf32>
    %cst_165 = arith.constant -1.45315206 : f32
    %375 = vector.broadcast %cst_165 : f32 to vector<8x16xf32>
    %376 = arith.addf %374, %375 : vector<8x16xf32>
    %377 = arith.mulf %376, %372 : vector<8x16xf32>
    %cst_166 = arith.constant 1.42141378 : f32
    %378 = vector.broadcast %cst_166 : f32 to vector<8x16xf32>
    %379 = arith.addf %377, %378 : vector<8x16xf32>
    %380 = arith.mulf %379, %372 : vector<8x16xf32>
    %cst_167 = arith.constant -0.284496725 : f32
    %381 = vector.broadcast %cst_167 : f32 to vector<8x16xf32>
    %382 = arith.addf %380, %381 : vector<8x16xf32>
    %383 = arith.mulf %382, %372 : vector<8x16xf32>
    %cst_168 = arith.constant 0.254829586 : f32
    %384 = vector.broadcast %cst_168 : f32 to vector<8x16xf32>
    %385 = arith.addf %383, %384 : vector<8x16xf32>
    %386 = arith.mulf %385, %372 : vector<8x16xf32>
    %cst_169 = arith.constant 0.000000e+00 : f32
    %387 = vector.broadcast %cst_169 : f32 to vector<8x16xf32>
    %388 = arith.subf %387, %366 : vector<8x16xf32>
    %389 = arith.mulf %388, %366 : vector<8x16xf32>
    %390 = math.exp %389 : vector<8x16xf32>
    %391 = arith.mulf %386, %390 : vector<8x16xf32>
    %cst_170 = arith.constant 1.000000e+00 : f32
    %392 = vector.broadcast %cst_170 : f32 to vector<8x16xf32>
    %393 = arith.subf %392, %391 : vector<8x16xf32>
    %394 = arith.mulf %365, %393 : vector<8x16xf32>
    %cst_171 = arith.constant 1.000000e+00 : f32
    %395 = vector.broadcast %cst_171 : f32 to vector<8x16xf32>
    %396 = arith.addf %395, %394 : vector<8x16xf32>
    %397 = arith.mulf %358, %396 : vector<8x16xf32>
    %c2_172 = arith.constant 2 : index
    %c0_173 = arith.constant 0 : index
    %c0_174 = arith.constant 0 : index
    %398 = vector.load %arg13[%c2_172, %c0_173, %c0_174] : memref<3x16x32xbf16, #tpu.memory_space<vmem>>, vector<1x16x32xbf16>
    %399 = vector.shape_cast %398 : vector<1x16x32xbf16> to vector<16x32xbf16>
    %400 = arith.truncf %397 : vector<8x16xf32> to vector<8x16xbf16>
    %cst_175 = arith.constant dense<0.000000e+00> : vector<8x32xf32>
    %401 = tpu.matmul %400, %399, %cst_175 {dimension_numbers = #tpu.dot_dimension_numbers<[1], [0], [0], [1], [0, 0, 1, 1], [], []>} : vector<8x16xbf16>, vector<16x32xbf16>, vector<8x32xf32> -> vector<8x32xf32>
    %c17 = arith.constant 17 : index
    %c0_176 = arith.constant 0 : index
    %402 = vector.load %arg2[%c17, %c0_176] : memref<20x32xf32, #tpu.memory_space<vmem>>, vector<1x32xf32>
    %403 = vector.broadcast %402 : vector<1x32xf32> to vector<8x32xf32>
    %404 = arith.addf %401, %403 : vector<8x32xf32>
    %405 = arith.addf %349, %404 : vector<8x32xf32>
    %c18 = arith.constant 18 : index
    %c0_177 = arith.constant 0 : index
    %406 = vector.load %arg2[%c18, %c0_177] : memref<20x32xf32, #tpu.memory_space<vmem>>, vector<1x32xf32>
    %c19 = arith.constant 19 : index
    %c0_178 = arith.constant 0 : index
    %407 = vector.load %arg2[%c19, %c0_178] : memref<20x32xf32, #tpu.memory_space<vmem>>, vector<1x32xf32>
    %cst_179 = arith.constant dense<0.000000e+00> : vector<8xf32>
    %408 = vector.multi_reduction <add>, %405, %cst_179 [1] : vector<8x32xf32> to vector<8xf32>
    %409 = vector.shape_cast %408 : vector<8xf32> to vector<8x1xf32>
    %cst_180 = arith.constant 3.200000e+01 : f32
    %410 = vector.broadcast %cst_180 : f32 to vector<8x1xf32>
    %411 = arith.divf %409, %410 : vector<8x1xf32>
    %412 = vector.broadcast %411 : vector<8x1xf32> to vector<8x32xf32>
    %413 = arith.subf %405, %412 : vector<8x32xf32>
    %414 = arith.mulf %413, %413 : vector<8x32xf32>
    %cst_181 = arith.constant dense<0.000000e+00> : vector<8xf32>
    %415 = vector.multi_reduction <add>, %414, %cst_181 [1] : vector<8x32xf32> to vector<8xf32>
    %416 = vector.shape_cast %415 : vector<8xf32> to vector<8x1xf32>
    %cst_182 = arith.constant 3.200000e+01 : f32
    %417 = vector.broadcast %cst_182 : f32 to vector<8x1xf32>
    %418 = arith.divf %416, %417 : vector<8x1xf32>
    %cst_183 = arith.constant 9.99999974E-6 : f32
    %419 = vector.broadcast %cst_183 : f32 to vector<8x1xf32>
    %420 = arith.addf %418, %419 : vector<8x1xf32>
    %421 = math.rsqrt %420 : vector<8x1xf32>
    %422 = vector.broadcast %421 : vector<8x1xf32> to vector<8x32xf32>
    %423 = arith.mulf %413, %422 : vector<8x32xf32>
    %424 = vector.broadcast %406 : vector<1x32xf32> to vector<8x32xf32>
    %425 = arith.mulf %423, %424 : vector<8x32xf32>
    %426 = vector.broadcast %407 : vector<1x32xf32> to vector<8x32xf32>
    %427 = arith.addf %425, %426 : vector<8x32xf32>
    %c0_184 = arith.constant 0 : index
    %c0_185 = arith.constant 0 : index
    %c0_186 = arith.constant 0 : index
    %428 = vector.load %arg14[%c0_184, %c0_185, %c0_186] : memref<1x8x32xf32, #tpu.memory_space<vmem>>, vector<1x8x32xf32>
    %429 = vector.shape_cast %428 : vector<1x8x32xf32> to vector<8x32xf32>
    %430 = vector.shape_cast %427 : vector<8x32xf32> to vector<1x8x32xf32>
    tpu.vector_store %arg14[%c0_184, %c0_185, %c0_186], %430 {strides = array<i32>} : memref<1x8x32xf32, #tpu.memory_space<vmem>>, vector<1x8x32xf32>,
    return
  }
  func.func @transform_0(%arg0: i32) -> (i32, i32, i32) {
    %c0_i32 = arith.constant 0 : i32
    %c0_i32_0 = arith.constant 0 : i32
    %c0_i32_1 = arith.constant 0 : i32
    return %arg0, %c0_i32, %c0_i32_0 : i32, i32, i32
  }
  func.func @transform_1(%arg0: i32) -> (i32, i32) {
    %c0_i32 = arith.constant 0 : i32
    %c0_i32_0 = arith.constant 0 : i32
    %c0_i32_1 = arith.constant 0 : i32
    return %c0_i32, %c0_i32_0 : i32, i32
  }
  func.func @transform_2(%arg0: i32) -> (i32, i32) {
    %c0_i32 = arith.constant 0 : i32
    %c0_i32_0 = arith.constant 0 : i32
    %c0_i32_1 = arith.constant 0 : i32
    return %c0_i32, %c0_i32_0 : i32, i32
  }
  func.func @transform_3(%arg0: i32) -> (i32, i32) {
    %c0_i32 = arith.constant 0 : i32
    %c0_i32_0 = arith.constant 0 : i32
    %c0_i32_1 = arith.constant 0 : i32
    return %c0_i32, %c0_i32_0 : i32, i32
  }
  func.func @transform_4(%arg0: i32) -> (i32, i32, i32) {
    %c0_i32 = arith.constant 0 : i32
    %c0_i32_0 = arith.constant 0 : i32
    %c0_i32_1 = arith.constant 0 : i32
    %c0_i32_2 = arith.constant 0 : i32
    return %c0_i32, %c0_i32_0, %c0_i32_1 : i32, i32, i32
  }
  func.func @transform_5(%arg0: i32) -> (i32, i32, i32) {
    %c0_i32 = arith.constant 0 : i32
    %c0_i32_0 = arith.constant 0 : i32
    %c0_i32_1 = arith.constant 0 : i32
    %c0_i32_2 = arith.constant 0 : i32
    return %c0_i32, %c0_i32_0, %c0_i32_1 : i32, i32, i32
  }
  func.func @transform_6(%arg0: i32) -> (i32, i32, i32) {
    %c0_i32 = arith.constant 0 : i32
    %c0_i32_0 = arith.constant 0 : i32
    %c0_i32_1 = arith.constant 0 : i32
    %c0_i32_2 = arith.constant 0 : i32
    return %c0_i32, %c0_i32_0, %c0_i32_1 : i32, i32, i32
  }
  func.func @transform_7(%arg0: i32) -> (i32, i32, i32) {
    %c0_i32 = arith.constant 0 : i32
    %c0_i32_0 = arith.constant 0 : i32
    %c0_i32_1 = arith.constant 0 : i32
    %c0_i32_2 = arith.constant 0 : i32
    return %c0_i32, %c0_i32_0, %c0_i32_1 : i32, i32, i32
  }
  func.func @transform_8(%arg0: i32) -> (i32, i32, i32) {
    %c0_i32 = arith.constant 0 : i32
    %c0_i32_0 = arith.constant 0 : i32
    %c0_i32_1 = arith.constant 0 : i32
    %c0_i32_2 = arith.constant 0 : i32
    return %c0_i32, %c0_i32_0, %c0_i32_1 : i32, i32, i32
  }
  func.func @transform_9(%arg0: i32) -> (i32, i32, i32) {
    %c0_i32 = arith.constant 0 : i32
    %c0_i32_0 = arith.constant 0 : i32
    %c0_i32_1 = arith.constant 0 : i32
    %c0_i32_2 = arith.constant 0 : i32
    return %c0_i32, %c0_i32_0, %c0_i32_1 : i32, i32, i32
  }
  func.func @transform_10(%arg0: i32) -> (i32, i32) {
    %c0_i32 = arith.constant 0 : i32
    %c0_i32_0 = arith.constant 0 : i32
    %c0_i32_1 = arith.constant 0 : i32
    return %c0_i32, %c0_i32_0 : i32, i32
  }
  func.func @transform_11(%arg0: i32) -> (i32, i32, i32) {
    %c0_i32 = arith.constant 0 : i32
    %c0_i32_0 = arith.constant 0 : i32
    %c0_i32_1 = arith.constant 0 : i32
    %c0_i32_2 = arith.constant 0 : i32
    return %c0_i32, %c0_i32_0, %c0_i32_1 : i32, i32, i32
  }
  func.func @transform_12(%arg0: i32) -> (i32, i32, i32) {
    %c0_i32 = arith.constant 0 : i32
    %c0_i32_0 = arith.constant 0 : i32
    %c0_i32_1 = arith.constant 0 : i32
    %c0_i32_2 = arith.constant 0 : i32
    return %c0_i32, %c0_i32_0, %c0_i32_1 : i32, i32, i32
  }
  func.func @transform_13(%arg0: i32) -> (i32, i32, i32) {
    %c0_i32 = arith.constant 0 : i32
    %c0_i32_0 = arith.constant 0 : i32
    %c0_i32_1 = arith.constant 0 : i32
    return %arg0, %c0_i32, %c0_i32_0 : i32, i32, i32
  }
}

</mosaic_0001>

<bundles_post_ra>
// kernel: _lambda_.1
= control target key start
LH: loop header
LB: loop body
LE: loop exit
PB: predicated region body
PF: predicated region fallthrough
CT: control target
= control target key end

     0   :  { %s5056_s0 = inlined_call_operand.hbm [shape: f32[2,8,32], index: 0, kind: input, shape index: {}]   ;;  %s5057_s1 = inlined_call_operand.hbm [shape: f32[20,32], index: 1, kind: input, shape index: {}]   ;;  %s5058_s2 = inlined_call_operand.vmem [shape: f32[2,64], index: 2, kind: input, shape index: {}]   ;;  %s5059_s3 = inlined_call_operand.vmem [shape: f32[3,16], index: 3, kind: input, shape index: {}]   ;;  %s5060_s4 = inlined_call_operand.hbm [shape: bf16[2,32,64], index: 4, kind: input, shape index: {}]   ;;  %s5061_s5 = inlined_call_operand.hbm [shape: bf16[2,64,32], index: 5, kind: input, shape index: {}]   ;;  %s5062_s6 = inlined_call_operand.hbm [shape: bf16[12,32,8], index: 6, kind: input, shape index: {}]   ;;  %s5063_s7 = inlined_call_operand.hbm [shape: f32[12,1,8], index: 7, kind: input, shape index: {}]   ;;  %s5064_s8 = inlined_call_operand.hbm [shape: bf16[4,8,32], index: 8, kind: input, shape index: {}]   ;;  %s5065_s9 = inlined_call_operand.hbm [shape: bf16[3,32,32], index: 9, kind: input, shape index: {}]   ;;  %s5066_s10 = inlined_call_operand.hbm [shape: f32[5,32], index: 10, kind: input, shape index: {}]   ;;  %s5067_s11 = inlined_call_operand.vmem [shape: bf16[3,32,16], index: 11, kind: input, shape index: {}]   ;;  %s5068_s12 = inlined_call_operand.vmem [shape: bf16[3,16,32], index: 12, kind: input, shape index: {}]   ;;  %s5069_s13 = inlined_call_operand.hbm [shape: f32[2,8,32], index: 13, kind: output, shape index: {}]  }
   0x1   :  { %5079 = sst [smem:[#allocation24_spill]] %s5057_s1 }
   0x2   :  { %5080 = sst [smem:[#allocation25_spill]] %s5060_s4 }
   0x3   :  { %5081 = sst [smem:[#allocation26_spill]] %s5061_s5 }
   0x4   :  { %5082 = sst [smem:[#allocation27_spill]] %s5062_s6 }
   0x5   :  { %5083 = sst [smem:[#allocation28_spill]] %s5063_s7 }
   0x6   :  { %5084 = sst [smem:[#allocation29_spill]] %s5064_s8 }
   0x7   :  { %5085 = sst [smem:[#allocation30_spill]] %s5065_s9 }
   0x8   :  { %5086 = sst [smem:[#allocation31_spill]] %s5069_s13 }
   0x9   :  { %18 = vsyncpa [#allocation3], 0 }
   0xa   :  { %20 = vsyncpa [#allocation3 + $0x1], 0 }
   0xb   :  { %21 = vsyncpa [#allocation6], 0 }
   0xc   :  { %22 = vsyncpa [#allocation9], 0 }
   0xd   :  { %23 = vsyncpa [#allocation12], 0 }
   0xe   :  { %24 = vsyncpa [#allocation15], 0 }
   0xf   :  { %25 = vsyncpa [#allocation4], 0 }
  0x10   :  { %27 = vsyncpa [#allocation4 + $0x1], 0  ;;  %s4506_s25 = smov 0   ;;  %s4508_s26 = smov 0  }
  0x11   :  { %s4510_s27 = smov 0   ;;  %s4512_s28 = smov 0  }
  0x12 LB: > { %s4417_s29 = smov [#allocation5]   ;;  %s4527_s14 = sadd.s32 4294967295, %s4415_s28   ;;  %s4415_s28 = sphi %s4512_s28, %s5121_s28   ;;  %s4411_s27 = sphi %s4510_s27, %s5120_s27   ;;  %s4407_s26 = sphi %s4508_s26, %s5119_s26   ;;  %s4403_s25 = sphi %s4506_s25, %s5118_s25  }
  0x13   : > { %s354_s30 = sshll.u32 %s4417_s29, 4  ;;  %p3315_p0 = scmp.ge.s32.totalorder %s4415_s28, 1  ;;  %s355_s30 = int_to_ptr.vmem [resolvable:$true] %s354_s30 }
  0x14   : > { %p5075_p1 = scmp.eq.s32.totalorder %s4527_s14, 0  ;;  %p342_p2 = scmp.lt.s32.totalorder %s4415_s28, 3 }
  0x15   : > { %s4418_s17 = smov [#allocation8]   ;;  %s4419_s19 = smov [#allocation11]  }
  0x16   : > { %p4532_p3 = pnand %p3315_p0, %p342_p2  ;;  %s386_s18 = sshll.u32 %s4418_s17, 4  ;;  %s4545_s18 = int_to_ptr.vmem [resolvable:$true] %s386_s18 }
  0x17   : > { %s4547_s20 = sshll.u32 %s4419_s19, 4  ;;  %s4110_s22 = scalar_lea.vmem %s355_s30, 384  ;;  %s413_s20 = int_to_ptr.vmem [resolvable:$true] %s4547_s20 }
  0x18   : > { %s5087_s15 = scalar_select %p4532_p3, 1, 0 }
  0x19   : > { %p3892_p5 = pneg %p4532_p3  ;;  %p4111_p8 = scmp.ne.s32.totalorder %s355_s30, %s4110_s22 }
  0x1a   : > { %p4118_p11 = scmp.lt.s32.totalorder %s355_s30, %s355_s30  ;;  %p4119_p12 = scmp.lt.s32.totalorder %s4110_s22, %s4110_s22 }
  0x1b   : > { %p4541_p6 = pnand %p3892_p5, %p5075_p1 }
  0x1c   : > { %p4120_p13 = por %p4119_p12, %p4118_p11 }
  0x1d   : > { %p4551_p7 = pneg %p4541_p6 }
  0x1f   : > { %p4113_p9 = pnand %p4111_p8, %p4551_p7 }
  0x21   : > { %p4114_p10 = pneg %p4113_p9 }
  0x23   : > { %p4121_p0 = pnand %p4120_p13, %p4114_p10 }
  0x25   : > { %4124 = shalt.err (!%p4121_p0)
}
  0x26   : > { %s4420_s23 = smov 128   ;;  %s4421_s24 = smov 8  }
  0x27   : > { %s5090_s1 = sld [smem:[#allocation24_spill]]  ;;  %s4136_s19 = scalar_lea.vmem %s4545_s18, 1024 }
  0x28   : > { %p4137_p2 = scmp.ne.s32.totalorder %s4545_s18, %s4136_s19  ;;  %p4144_p9 = scmp.lt.s32.totalorder %s4545_s18, %s4545_s18 }
  0x29   : > { %p4145_p10 = scmp.lt.s32.totalorder %s4136_s19, %s4136_s19 }
  0x2a   : > { %p4139_p5 = pnand %p4137_p2, %p4551_p7 }
  0x2b   : > { %p4146_p11 = por %p4145_p10, %p4144_p9 }
  0x2c   : > { %p4140_p8 = pneg %p4139_p5 }
  0x2d   : > { %3895 = dma.hbm_to_vmem [thread:$0]  (!%p4541_p6), %s5090_s1, 384, %s355_s30, [#allocation6], %s4420_s23, %s4420_s23, %s4421_s24  }
  0x2e   : > { %p4147_p12 = pnand %p4146_p11, %p4140_p8 }
  0x30   : > { %4150 = shalt.err (!%p4147_p12)
}
  0x31   : > { %s5071_s22 = smov 64   ;;  %s5073_s13 = smov 4  }
  0x32   : > { %s5091_s5 = sld [smem:[#allocation26_spill]]  ;;  %s4162_s24 = scalar_lea.vmem %s413_s20, 192 }
  0x33   : > { %p4163_p13 = scmp.ne.s32.totalorder %s413_s20, %s4162_s24  ;;  %p4170_p5 = scmp.lt.s32.totalorder %s413_s20, %s413_s20 }
  0x34   : > { %p4171_p8 = scmp.lt.s32.totalorder %s4162_s24, %s4162_s24 }
  0x35   : > { %p4165_p0 = pnand %p4163_p13, %p4551_p7 }
  0x36   : > { %p4172_p9 = por %p4171_p8, %p4170_p5 }
  0x37   : > { %p4166_p2 = pneg %p4165_p0 }
  0x38   : > { %3901 = dma.hbm_to_vmem [thread:$0]  (!%p4541_p6), %s5091_s5, 1024, %s4545_s18, [#allocation9], %s5071_s22, %s5071_s22, %s5073_s13  }
  0x39   : > { %p4173_p10 = pnand %p4172_p9, %p4166_p2 }
  0x3b   : > { %4176 = shalt.err (!%p4173_p10)
}
  0x3c   : > { %s4424_s29 = smov 16   ;;  %s4425_s17 = smov 1  }
  0x3d   : > { %s5092_s7 = sld [smem:[#allocation28_spill]]  ;;  %s4426_s18 = smov [#allocation14]  }
  0x3e   : > { %s438_s30 = sshll.u32 %s4426_s18, 4  ;;  %s4427_s23 = smov [#allocation7]   ;;  %s439_s30 = int_to_ptr.vmem [resolvable:$true] %s438_s30 }
  0x3f   : > { %s373_s22 = sshll.u32 %s4427_s23, 4  ;;  %s4188_s13 = scalar_lea.vmem %s439_s30, 768  ;;  %s374_s22 = int_to_ptr.vmem [resolvable:$true] %s373_s22 }
  0x40   : > { %p4189_p11 = scmp.ne.s32.totalorder %s439_s30, %s4188_s13  ;;  %p4196_p0 = scmp.lt.s32.totalorder %s439_s30, %s439_s30 }
  0x41   : > { %p4197_p2 = scmp.lt.s32.totalorder %s4188_s13, %s4188_s13 }
  0x42   : > { %p4191_p12 = pnand %p4189_p11, %p4551_p7 }
  0x43   : > { %3907 = dma.hbm_to_vmem [thread:$0]  (!%p4541_p6), %s5092_s7, 192, %s413_s20, [#allocation12], %s4424_s29, %s4424_s29, %s4425_s17  }
  0x44   : > { %p4192_p13 = pneg %p4191_p12  ;;  %p4198_p5 = por %p4197_p2, %p4196_p0 }
  0x46   : > { %p4199_p8 = pnand %p4198_p5, %p4192_p13 }
  0x48   : > { %4202 = shalt.err (!%p4199_p8)
}
  0x49   : > { %s5093_s24 = smov 4   ;;  %s5094_s1 = smov 64  }
  0x4a   : > { %s5095_s9 = sld [smem:[#allocation30_spill]]  ;;  %s4214_s17 = scalar_lea.vmem %s374_s22, 512 }
  0x4b   : > { %p4215_p9 = scmp.ne.s32.totalorder %s374_s22, %s4214_s17  ;;  %p4222_p12 = scmp.lt.s32.totalorder %s374_s22, %s374_s22 }
  0x4c   : > { %p4223_p0 = scmp.lt.s32.totalorder %s4214_s17, %s4214_s17 }
  0x4d   : > { %p4217_p10 = pnand %p4215_p9, %p4551_p7 }
  0x4e   : > { %p4224_p13 = por %p4223_p0, %p4222_p12 }
  0x4f   : > { %p4218_p11 = pneg %p4217_p10 }
  0x50   : > { %3913 = dma.hbm_to_vmem [thread:$0]  (!%p4541_p6), %s5095_s9, 768, %s439_s30, [#allocation15], %s5094_s1, %s5094_s1, %s5093_s24  }
  0x51   : > { %p4225_p2 = pnand %p4224_p13, %p4218_p11 }
  0x53   : > { %4228 = shalt.err (!%p4225_p2)
}
  0x54   : > { %s5096_s4 = sld [smem:[#allocation25_spill]]  ;;  %s4428_s18 = smov [#allocation10]  }
  0x55   : > { %s399_s30 = sshll.u32 %s4428_s18, 4  ;;  %s4429_s23 = smov [#allocation13]   ;;  %s400_s30 = int_to_ptr.vmem [resolvable:$true] %s399_s30 }
  0x56   : > { %s425_s20 = sshll.u32 %s4429_s23, 4  ;;  %s4240_s29 = scalar_lea.vmem %s400_s30, 3072  ;;  %s426_s20 = int_to_ptr.vmem [resolvable:$true] %s425_s20 }
  0x57   : > { %p4241_p5 = scmp.ne.s32.totalorder %s400_s30, %s4240_s29  ;;  %p4248_p10 = scmp.lt.s32.totalorder %s400_s30, %s400_s30 }
  0x58   : > { %p4249_p11 = scmp.lt.s32.totalorder %s4240_s29, %s4240_s29 }
  0x59   : > { %p4243_p8 = pnand %p4241_p5, %p4551_p7 }
  0x5a   : > { %3898 = dma.hbm_to_vmem [thread:$0]  (!%p4541_p6), %s5096_s4, 512, %s374_s22, [#allocation6], %s5094_s1, %s5094_s1, %s5093_s24  }
  0x5b   : > { %p4244_p9 = pneg %p4243_p8  ;;  %p4250_p12 = por %p4249_p11, %p4248_p10 }
  0x5d   : > { %p4251_p0 = pnand %p4250_p12, %p4244_p9 }
  0x5f   : > { %4254 = shalt.err (!%p4251_p0)
}
  0x60   : > { %s5097_s6 = sld [smem:[#allocation27_spill]]  ;;  %s4266_s13 = scalar_lea.vmem %s426_s20, 256 }
  0x61   : > { %p4267_p13 = scmp.ne.s32.totalorder %s426_s20, %s4266_s13  ;;  %p4274_p8 = scmp.lt.s32.totalorder %s426_s20, %s426_s20 }
  0x62   : > { %p4275_p10 = scmp.lt.s32.totalorder %s4266_s13, %s4266_s13 }
  0x63   : > { %p4269_p2 = pnand %p4267_p13, %p4551_p7 }
  0x64   : > { %p4276_p9 = por %p4275_p10, %p4274_p8 }
  0x65   : > { %p4270_p5 = pneg %p4269_p2 }
  0x66   : > { %3904 = dma.hbm_to_vmem [thread:$0]  (!%p4541_p6), %s5097_s6, 3072, %s400_s30, [#allocation9], %s5094_s1, %s5094_s1, %s5093_s24  }
  0x67   : > { %p4277_p11 = pnand %p4276_p9, %p4270_p5 }
  0x69   : > { %4280 = shalt.err (!%p4277_p11)
}
  0x6a   : > { %s5098_s8 = sld [smem:[#allocation29_spill]]  ;;  %s4430_s30 = smov [#allocation16]  }
  0x6b   : > { %s452_s23 = sshll.u32 %s4430_s30, 4  ;;  %s453_s23 = int_to_ptr.vmem [resolvable:$true] %s452_s23 }
  0x6c   : > { %s4292_s29 = scalar_lea.vmem %s453_s23, 128  ;;  %p4300_p2 = scmp.lt.s32.totalorder %s453_s23, %s453_s23 }
  0x6d   : > { %p4293_p12 = scmp.ne.s32.totalorder %s453_s23, %s4292_s29  ;;  %p4301_p5 = scmp.lt.s32.totalorder %s4292_s29, %s4292_s29 }
  0x6f   : > { %p4295_p0 = pnand %p4293_p12, %p4551_p7  ;;  %p4302_p8 = por %p4301_p5, %p4300_p2 }
  0x70   : > { %3910 = dma.hbm_to_vmem [thread:$0]  (!%p4541_p6), %s5098_s8, 256, %s426_s20, [#allocation12], %s5094_s1, %s5094_s1, %s5093_s24  }
  0x71   : > { %p4296_p13 = pneg %p4295_p0 }
  0x73   : > { %p4303_p10 = pnand %p4302_p8, %p4296_p13 }
  0x75   : > { %4306 = shalt.err (!%p4303_p10)
}
  0x76   : > { %3916 = dma.hbm_to_vmem [thread:$0]  (!%p4541_p6), %s5066_s10, 128, %s453_s23, [#allocation15]  }
  0x77   : > { %s3314_s21 = sadd.s32 4294967294, %s4415_s28   ;;  %s4634_s16 = sadd.s32 1, %s4415_s28  }
  0x78   : > { %s37_s24 = ssub.s32 %s4415_s28, %s4634_s16  ;;  %s40_s1 = sadd.s32 1, %s4411_s27 }
  0x79   : > { %p38_p7 = scmp.eq.s32.totalorder %s37_s24, 0  ;;  %p47_p9 = scmp.ne.s32.totalorder %s4411_s27, %s4407_s26 }
  0x7a   : > { %p48_p11 = scmp.eq.s32.totalorder %s4415_s28, 0  ;;  %p53_p12 = scmp.ne.s32.totalorder %s4407_s26, %s4403_s25 }
  0x7b   : > { %s4645_s20 = scalar_select %p38_p7, %s4411_s27, %s40_s1  }
  0x7c   : > { %p4647_p0 = por %p48_p11, %p47_p9  ;;  %p4653_p6 = por %p5075_p1, %p53_p12 }
  0x7d   : > { %p329_p13 = scmp.eq.s32.totalorder %s4527_s14, 1  ;;  %p335_p2 = scmp.eq.s32.totalorder %s3314_s21, 1 }
  0x7e   : > { %s5100_s19 = scalar_select %p4653_p6, 1, 0 }
  0x7f   : > { %p3933_p5 = scmp.lt.s32.totalorder %s4415_s28, 2  ;;  %s469_s18 = sand.u32 1, %s4411_s27  }
  0x80   : > { %p4660_p8 = por %p329_p13, %p47_p9  ;;  %p4664_p10 = por %p335_p2, %p53_p12 }
  0x81   : > { %s3325_s29 = sshll.u32 %s469_s18, 3  ;;  %s3326_s22 = sshll.u32 %s4415_s28, 7 }
  0x82   : > { %s5101_s30 = scalar_select %p4660_p8, 1, 0 }
  0x83   : > { %s5102_s23 = scalar_select %p4664_p10, 1, 0 }
  0x84   : > { %s4672_s1 = scalar_lea.hbm %s5056_s0, %s3326_s22  ;;  %s473_s21 = scalar_lea.vmem [#allocation2], %s3325_s29 }
  0x85   : > { %s480_s4 = sshll.u32 %s473_s21, 4  ;;  %p4676_p7 = pnand %p3933_p5, %p4647_p0  ;;  %s481_s4 = int_to_ptr.vmem [resolvable:$true] %s480_s4 }
  0x86   : > { %s470_s6 = scalar_lea.sflag [#allocation3], %s469_s18  ;;  %s4307_s7 = scalar_lea.hbm %s4672_s1, 128 }
  0x87   : > { %p4308_p9 = scmp.ne.s32.totalorder %s4672_s1, %s4307_s7  ;;  %p4309_p11 = pneg %p4676_p7 }
  0x88   : > { %s4312_s24 = scalar_lea.hbm %s5056_s0, 256  ;;  %p4313_p2 = scmp.lt.s32.totalorder %s4672_s1, %s5056_s0 }
  0x89   : > { %p4310_p12 = pnand %p4309_p11, %p4308_p9  ;;  %p4314_p0 = scmp.lt.s32.totalorder %s4312_s24, %s4307_s7 }
  0x8b   : > { %p4311_p13 = pneg %p4310_p12  ;;  %p4315_p5 = por %p4314_p0, %p4313_p2 }
  0x8d   : > { %p4316_p4 = pnand %p4315_p5, %p4311_p13 }
  0x8f   : > { %4319 = shalt.err (!%p4316_p4)
}
  0x90   : > { %s4320_s13 = scalar_lea.vmem %s481_s4, 128  ;;  %s4431_s18 = smov [#allocation2]  }
  0x91   : > { %p4321_p1 = scmp.ne.s32.totalorder %s481_s4, %s4320_s13  ;;  %s4325_s8 = sshll.u32 %s4431_s18, 4  ;;  %s4326_s8 = int_to_ptr.vmem [resolvable:$false] %s4325_s8 }
  0x92   : > { %s4327_s9 = scalar_lea.vmem %s4326_s8, 256  ;;  %p4328_p9 = scmp.lt.s32.totalorder %s481_s4, %s4326_s8 }
  0x93   : > { %p4323_p10 = pnand %p4321_p1, %p4309_p11  ;;  %p4329_p12 = scmp.lt.s32.totalorder %s4327_s9, %s4320_s13 }
  0x95   : > { %p4324_p8 = pneg %p4323_p10  ;;  %p4330_p6 = por %p4329_p12, %p4328_p9 }
  0x97   : > { %p4331_p3 = pnand %p4330_p6, %p4324_p8 }
  0x99   : > { %4334 = shalt.err (!%p4331_p3)
}
  0x9a   : > { %3920 = dma.hbm_to_vmem [thread:$0]  (!%p4676_p7), %s4672_s1, 128, %s481_s4, %s470_s6  }
  0x9b   : > { %p5104_p13 = scmp.ne.s32.totalorder %s5087_s15, 0 }
  0x9c   : > { %s4697_s7 = sand.u32 (!%p5104_p13), 1, %s4407_s26   ;;  %p5105_p1 = scmp.ne.s32.totalorder (!%p5104_p13), %s5100_s19, 0 }
  0x9d   : > { %489 = sbr.rel (%p5104_p13) target bundleno = 5552 (0x15b0), region = 72  ;;  %s3328_s22 = sshll.u32 (!%p5104_p13), %s4697_s7, 3 }
  0x9e   : > { %s492_s8 = scalar_lea.sflag (!%p5104_p13), [#allocation3], %s4697_s7  ;;  %s495_s9 = scalar_lea.vmem (!%p5104_p13), [#allocation2], %s3328_s22 }
  0xa2   : > { %4378 = dma.done.wait (%p5105_p1), %s492_s8, 128  }
  0xa3   : > { %4380 = vsyncadd (%p5105_p1), %s492_s8, 4294967168  ;;  %p5106_p3 = scmp.eq.s32.totalorder %s4527_s14, 0 }
  0xa5   : > { %4382 = dma.done.wait (%p5106_p3), [#allocation6], 896   ;;  %p5107_p4 = pmov %p5106_p3 }
  0xa6   : > { %p5108_p6 = pmov %p5106_p3 }
  0xa7   : > { %4384 = vsyncadd (%p5107_p4), [#allocation6], 4294966400 }
  0xa8   : > { %4386 = dma.done.wait (%p5108_p6), [#allocation9], 4096   ;;  %p5109_p8 = pmov %p5106_p3 }
  0xa9   : > { %p5110_p10 = pmov %p5106_p3 }
  0xaa   : > { %4388 = vsyncadd (%p5109_p8), [#allocation9], 4294963200 }
  0xab   : > { %4390 = dma.done.wait (%p5110_p10), [#allocation12], 448   ;;  %p5111_p7 = pmov %p5106_p3 }
  0xac   : > { %p5112_p11 = pmov %p5106_p3 }
  0xad   : > { %4392 = vsyncadd (%p5111_p7), [#allocation12], 4294966848 }
  0xae   : > { %4394 = dma.done.wait (%p5112_p11), [#allocation15], 896   ;;  %p5113_p2 = pmov %p5106_p3 }
  0xaf   : > { %vm587_vm0 = vcmask 261120   ;;  %v4723_v0 = vld [vmem:[%s495_s9] sm:$0xff]  ;;  %v3992_v7 = vld [vmem:[#allocation7 + $0x8] sm:$0xff]   ;;  %v4432_v8 = vmov 0.0   ;;  %vm4433_vm1 = vmmov 0   ;;  %v3995_v21 = vld [vmem:[#allocation8 + $0x10] sm:$0xff]  }
  0xb0   : > { %4396 = vsyncadd (%p5113_p2), [#allocation15], 4294966400  ;;  %v588_v1 = vsel %vm587_vm0, %v4723_v0, 0.0  ;;  %3582 = vmatprep.subr.bf16.mxu0 %v4432_v8  ;;  %3586 = vmatprep.mubr.msk.bf16.mxu0 %vm4433_vm1, %v4432_v8  ;;  %v3993_v9 = vld [vmem:[#allocation7] sm:$0xff]   ;;  %v3338_v14 = vld [vmem:[#allocation5] ss:$0 sm:$0xff] }
  0xb1   : > { %589 = vadd.xlane.f32.xlu0 %v588_v1  ;;  %3583 = vmatpush3.bf16.msra.mxu0 %v3992_v7  ;;  %v3339_v16 = vld [vmem:[#allocation5 + $0x1] ss:$0 sm:$0xff]  ;;  %v3994_v20 = vld [vmem:[#allocation8 + $0x18] sm:$0xff]   ;;  %v3997_v23 = vld [vmem:[#allocation8] sm:$0xff]   ;;  %vm709_vm2 = vcmask 523264   ;;  %vm861_vm4 = vcmask 130048  }
  0xb2   : > { %3590 = vmatprep.subr.bf16.mxu1 %v4432_v8  ;;  %3584 = vmatprep.subr.bf16.mxu0 %v4432_v8  ;;  %v3996_v22 = vld [vmem:[#allocation8 + $0x8] sm:$0xff]   ;;  %v3340_v24 = vld [vmem:[%s5058_s2] ss:$0 sm:$0xff]  ;;  %v3998_v36 = vld [vmem:[%s5067_s11 + $0x8] sm:$0xff]   ;;  %vm1699_vm5 = vcmask 64512   ;;  %vm1943_vm6 = vcmask 1043456  }
  0xb3   : > { %3598 = vmatprep.mubr.msk.bf16.mxu1 %vm4433_vm1, %v4432_v8  ;;  %3591 = vmatpush3.bf16.msra.mxu1 %v3994_v20  ;;  %v3999_v37 = vld [vmem:[%s5067_s11] sm:$0xff]   ;;  %v3345_v38 = vld [vmem:[#allocation5 + $0x2] ss:$0 sm:$0xff]  ;;  %vm2635_vm8 = vcmask 1041408   ;;  %vm2652_vm9 = vcmask 1046528   ;;  %vm2666_vm10 = vcmask 1045504  }
  0xb4   : > { %3592 = vmatprep.subr.bf16.mxu1 %v4432_v8  ;;  %v4000_v47 = vld [vmem:[%s5068_s12] sm:$0xff]   ;;  %vm2680_vm11 = vcmask 1044480   ;;  %s3479_s4 = sshll.u32 %s4527_s14, 7  ;;  %s569_s5 = scalar_lea.vmem [#allocation17], %s3328_s22 }
  0xb5   : > { %3585 = vmatpush3.bf16.msra.mxu0 %v3993_v9  ;;  %v3351_v48 = vld [vmem:[%s5059_s3] ss:$0 sm:$0xff]  ;;  %s3168_s6 = sshll.u32 %s569_s5, 4  ;;  %s5114_s1 = sld [smem:[#allocation31_spill]]  ;;  %s3169_s6 = int_to_ptr.vmem [resolvable:$true] %s3168_s6 }
  0xb6   : > { %3602 = vmatprep.subr.bf16.mxu0 %v4432_v8  ;;  %s3155_s24 = scalar_lea.sflag [#allocation4], %s4697_s7  ;;  %s4335_s29 = scalar_lea.vmem %s3169_s6, 128 }
  0xb7   : > { %3593 = vmatpush3.bf16.msra.mxu1 %v3995_v21  ;;  %p4336_p0 = scmp.ne.s32.totalorder %s3169_s6, %s4335_s29  ;;  %p5115_p5 = scmp.ne.s32.totalorder %s5101_s30, 0 }
  0xb8   : > { %3594 = vmatprep.subr.bf16.mxu1 %v4432_v8  ;;  %s4435_s21 = smov [#allocation17]  }
  0xb9   : > { %p4337_p9 = pnand %p4336_p0, %p5115_p5  ;;  %s4339_s14 = sshll.u32 %s4435_s21, 4  ;;  %s4340_s14 = int_to_ptr.vmem [resolvable:$false] %s4339_s14 }
  0xba   : > { %s4341_s22 = scalar_lea.vmem %s4340_s14, 256  ;;  %p4342_p13 = scmp.lt.s32.totalorder %s3169_s6, %s4340_s14 }
  0xbb   : > { %3595 = vmatpush3.bf16.msra.mxu1 %v3996_v22  ;;  %s3166_s17 = scalar_lea.hbm %s5114_s1, %s3479_s4  ;;  %p4338_p12 = pneg %p4337_p9 }
  0xbc   : > { %3596 = vmatprep.subr.bf16.mxu1 %v4432_v8  ;;  %p4343_p1 = scmp.lt.s32.totalorder %s4341_s22, %s4335_s29 }
  0xbe   : > { %p4344_p3 = por %p4343_p1, %p4342_p13 }
  0xbf   : > { %3597 = vmatpush3.bf16.msra.mxu1 %v3997_v23 }
  0xc0   : > { %3616 = vmatprep.subr.bf16.mxu1 %v4432_v8  ;;  %p4345_p4 = pnand %p4344_p3, %p4338_p12 }
 0x13a   : > { %v590_v2 = vpop.xlane.xlu0 %589 }
 0x13b   : > { %v592_v3 = vmul.f32 0.03125, %v590_v2 }
 0x13d   : > { %v593_v4 = vsub.f32 %v4723_v0, %v592_v3 }
 0x13f   : > { %v594_v5 = vmul.f32 %v593_v4, %v593_v4 }
 0x141   : > { %v595_v6 = vsel %vm587_vm0, %v594_v5, 0.0 }
 0x142   : > { %596 = vadd.xlane.f32.xlu0 %v595_v6 }
 0x1cb   : > { %v597_v10 = vpop.xlane.xlu0 %596 }
 0x1cc   : > { %v598_v11 = vmul.f32 0.03125, %v597_v10 }
 0x1ce   : > { %v599_v12 = vadd.f32 1e-05, %v598_v11  ;;  %v4434_v11 = vmov -1.0  }
 0x1d0   : > { %4043 = vrsqrt.f32 %v599_v12 }
 0x1dd   : > { %v4044_v13 = vpop.eup %4043 }
 0x1de   : > { %v601_v15 = vmul.f32 %v4044_v13, %v593_v4 }
 0x1e0   : > { %v606_v17 = vmul.f32 %v3338_v14, %v601_v15 }
 0x1e2   : > { %v611_v18 = vadd.f32 %v3339_v16, %v606_v17 }
 0x1e4   : > { %v612_v19 = vpack.c.bf16 %v611_v18, %v611_v18  ;;  %v3355_v18 = vld [vmem:[#allocation5 + $0xf] ss:$0 sm:$0xff] }
 0x1e6   : > { %3587 = vmatmul.mubr.msk.bf16.vlgmr.msra.gmra.mxu0 %vm587_vm0, %v612_v19 }
 0x1e7   : > { %3606 = vmatprep.mubr.msk.bf16.mxu0 %vm4433_vm1, %v4432_v8  ;;  %3603 = vmatpush3.bf16.msra.mxu0 %v3998_v36 }
 0x1e8   : > { %3604 = vmatprep.subr.bf16.mxu0 %v4432_v8 }
 0x1eb   : > { %3605 = vmatpush3.bf16.msra.mxu0 %v3999_v37 }
 0x1ec   : > { %3610 = vmatprep.subr.bf16.mxu0 %v4432_v8 }
 0x2a6   : > { %v666_v25 = vpop.f32.mrf.mxu0 }
 0x2a7   : > { %v667_v26 = vadd.f32 %v3340_v24, %v666_v25 }
 0x2a8   : > { %v3588_v27 = vpop.f32.mrf.mxu0 }
 0x2a9   : > { %v3344_v28 = vmul.f32 -1.442695, %v667_v26 }
 0x2aa   : > { %v669_v29 = vpop.f32.mrf.mxu0 }
 0x2ab   : > { %4045 = vpow2.f32 %v3344_v28 }
 0x2ac   : > { %v3589_v30 = vpop.f32.mrf.mxu0 }
 0x2b8   : > { %v4046_v31 = vpop.eup %4045 }
 0x2b9   : > { %v675_v32 = vadd.f32 1.0, %v4046_v31  ;;  %v4001_v31 = vld [vmem:[#allocation10 + $0x8] sm:$0xff]  }
 0x2bb   : > { %4047 = vrcp.f32 %v675_v32  ;;  %v4002_v32 = vld [vmem:[#allocation10 + $0x18] sm:$0xff]  }
 0x2c8   : > { %v4048_v33 = vpop.eup %4047 }
 0x2c9   : > { %v678_v34 = vmul.f32 %v4048_v33, %v667_v26  ;;  %v4003_v33 = vld [vmem:[#allocation10] sm:$0xff]  }
 0x2cb   : > { %v679_v35 = vpack.c.bf16 %v678_v34, %v678_v34  ;;  %v4004_v34 = vld [vmem:[#allocation10 + $0x10] sm:$0xff]  }
 0x2cd   : > { %3599 = vmatmul.mubr.msk.bf16.vlgmr.msra.gmra.mxu1 %vm709_vm2, %v679_v35 }
 0x2ce   : > { %3620 = vmatprep.mubr.msk.bf16.mxu1 %vm4433_vm1, %v4432_v8  ;;  %3617 = vmatpush3.bf16.msra.mxu1 %v4001_v31  ;;  %v3361_v31 = vld [vmem:[#allocation11 + $0x1] ss:$0 sm:$0xff] }
 0x2cf   : > { %3618 = vmatprep.subr.bf16.mxu1 %v4432_v8 }
 0x2d2   : > { %3619 = vmatpush3.bf16.msra.mxu1 %v4003_v33 }
 0x2d3   : > { %3632 = vmatprep.subr.bf16.mxu1 %v4432_v8 }
 0x38d   : > { %v747_v39 = vpop.f32.mrf.mxu1 }
 0x38e   : > { %v748_v40 = vadd.f32 %v3345_v38, %v747_v39  ;;  %v3358_v39 = vld [vmem:[#allocation5 + $0x3] ss:$0 sm:$0xff] }
 0x38f   : > { %v3600_v41 = vpop.f32.mrf.mxu1 }
 0x390   : > { %v753_v42 = vmul.f32 0.5, %v748_v40  ;;  %v3359_v41 = vld [vmem:[#allocation5 + $0x4] ss:$0 sm:$0xff] }
 0x391   : > { %v750_v43 = vpop.f32.mrf.mxu1 }
 0x392   : > { %v754_v44 = vadd.f32 %v753_v42, %v4723_v0 }
 0x393   : > { %v3601_v45 = vpop.f32.mrf.mxu1 }
 0x394   : > { %v759_v46 = vpack.c.bf16 %v754_v44, %v754_v44  ;;  %v4006_v45 = vld [vmem:[#allocation10 + $0x38] sm:$0xff]  }
 0x396   : > { %3607 = vmatmul.mubr.msk.bf16.vlgmr.msra.gmra.mxu0 %vm587_vm0, %v759_v46 }
 0x397   : > { %3612 = vmatprep.mubr.msk.bf16.mxu0 %vm4433_vm1, %v4432_v8  ;;  %3611 = vmatpush3.bf16.msra.mxu0 %v4000_v47  ;;  %v4007_v47 = vld [vmem:[#allocation10 + $0x20] sm:$0xff]  }
 0x398   : > { %3624 = vmatprep.subr.bf16.mxu0 %v4432_v8 }
 0x456   : > { %v814_v49 = vpop.f32.mrf.mxu0 }
 0x457   : > { %v815_v50 = vadd.f32 %v3351_v48, %v814_v49  ;;  %v4008_v48 = vld [vmem:[#allocation10 + $0x30] sm:$0xff]   ;;  %v4009_v49 = vld [vmem:[#allocation10 + $0x48] sm:$0xff]  }
 0x458   : > { %v3608_v51 = vpop.f32.mrf.mxu0 }
 0x459   : > { %v821_v52 = vmul.f32 0.70710677, %v815_v50  ;;  %v820_v14 = vmul.f32 0.5, %v815_v50  ;;  %v4010_v50 = vld [vmem:[#allocation10 + $0x58] sm:$0xff]   ;;  %v4011_v51 = vld [vmem:[#allocation10 + $0x40] sm:$0xff]  }
 0x45a   : > { %v817_v53 = vpop.f32.mrf.mxu0 }
 0x45b   : > { %v824_v54 = vand.u32 2147483647, %v821_v52  ;;  %vm822_vm3 = vcmp.ge.f32.partialorder %v821_v52, 0.0  ;;  %v4012_v52 = vld [vmem:[#allocation10 + $0x50] sm:$0xff]   ;;  %v4013_v53 = vld [vmem:[#allocation10 + $0x68] sm:$0xff]  }
 0x45c   : > { %v3609_v55 = vpop.f32.mrf.mxu0  ;;  %v823_v12 = vsel %vm822_vm3, 1.0, %v4434_v11 }
 0x45d   : > { %v825_v56 = vmul.f32 0.3275911, %v824_v54  ;;  %v838_v58 = vsub.f32 0.0, %v824_v54  ;;  %v4015_v55 = vld [vmem:[#allocation10 + $0x60] sm:$0xff]  }
 0x45f   : > { %v826_v57 = vadd.f32 1.0, %v825_v56  ;;  %v839_v59 = vmul.f32 %v838_v58, %v824_v54  ;;  %v4014_v54 = vld [vmem:[#allocation10 + $0x78] sm:$0xff]   ;;  %v4016_v56 = vld [vmem:[#allocation10 + $0x70] sm:$0xff]  }
 0x460   : > { %v4018_v58 = vld [vmem:[#allocation10 + $0x98] sm:$0xff]  }
 0x461   : > { %4049 = vrcp.f32 %v826_v57  ;;  %v840_v62 = vmul.f32 1.442695, %v839_v59  ;;  %v4017_v57 = vld [vmem:[#allocation10 + $0x88] sm:$0xff]   ;;  %v4019_v59 = vld [vmem:[#allocation10 + $0x80] sm:$0xff]  }
 0x463   : > { %4051 = vpow2.f32 %v840_v62  ;;  %v4022_v62 = vld [vmem:[#allocation10 + $0xb8] sm:$0xff]  }
 0x46e   : > { %v4050_v60 = vpop.eup %4049 }
 0x46f   : > { %v829_v61 = vmul.f32 1.0614054, %v4050_v60 }
 0x470   : > { %v4052_v7 = vpop.eup %4051 }
 0x471   : > { %v830_v63 = vadd.f32 -1.4531521, %v829_v61  ;;  %v4021_v61 = vld [vmem:[#allocation10 + $0xa8] sm:$0xff]  }
 0x473   : > { %v831_v0 = vmul.f32 %v4050_v60, %v830_v63  ;;  %v4023_v63 = vld [vmem:[#allocation10 + $0xa0] sm:$0xff]  }
 0x475   : > { %v832_v1 = vadd.f32 1.4214138, %v831_v0  ;;  %v4024_v0 = vld [vmem:[#allocation10 + $0xb0] sm:$0xff]  }
 0x477   : > { %v833_v2 = vmul.f32 %v4050_v60, %v832_v1 }
 0x479   : > { %v834_v3 = vadd.f32 -0.28449672, %v833_v2 }
 0x47b   : > { %v835_v4 = vmul.f32 %v4050_v60, %v834_v3 }
 0x47d   : > { %v836_v5 = vadd.f32 0.2548296, %v835_v4 }
 0x47f   : > { %v837_v6 = vmul.f32 %v4050_v60, %v836_v5  ;;  %v4020_v60 = vld [vmem:[#allocation10 + $0x90] sm:$0xff]  }
 0x481   : > { %v842_v9 = vmul.f32 %v4052_v7, %v837_v6 }
 0x483   : > { %v843_v10 = vsub.f32 1.0, %v842_v9 }
 0x485   : > { %v844_v13 = vmul.f32 %v843_v10, %v823_v12 }
 0x487   : > { %v845_v15 = vadd.f32 1.0, %v844_v13 }
 0x489   : > { %v846_v16 = vmul.f32 %v845_v15, %v820_v14 }
 0x48b   : > { %v849_v17 = vpack.c.bf16 %v846_v16, %v846_v16 }
 0x48d   : > { %3613 = vmatmul.mubr.msk.bf16.vlgmr.msra.gmra.mxu0 %vm861_vm4, %v849_v17 }
 0x48e   : > { %3628 = vmatprep.mubr.msk.bf16.mxu0 %vm4433_vm1, %v4432_v8  ;;  %3625 = vmatpush3.bf16.msra.mxu0 %v4002_v32 }
 0x48f   : > { %3626 = vmatprep.subr.bf16.mxu0 %v4432_v8 }
 0x492   : > { %3627 = vmatpush3.bf16.msra.mxu0 %v4004_v34 }
 0x493   : > { %3640 = vmatprep.subr.bf16.mxu0 %v4432_v8 }
 0x54d   : > { %v899_v19 = vpop.f32.mrf.mxu0 }
 0x54e   : > { %v900_v20 = vadd.f32 %v3355_v18, %v899_v19  ;;  %v3364_v19 = vld [vmem:[#allocation11 + $0x4] ss:$0 sm:$0xff] }
 0x54f   : > { %v3614_v21 = vpop.f32.mrf.mxu0 }
 0x550   : > { %v4773_v22 = vadd.f32 %v900_v20, %v754_v44  ;;  %v4005_v44 = vld [vmem:[#allocation10 + $0x28] sm:$0xff]   ;;  %v3365_v20 = vld [vmem:[#allocation11 + $0x5] ss:$0 sm:$0xff] }
 0x551   : > { %v902_v23 = vpop.f32.mrf.mxu0 }
 0x552   : > { %v908_v24 = vsel %vm587_vm0, %v4773_v22, 0.0 }
 0x553   : > { %909 = vadd.xlane.f32.xlu1 %v908_v24  ;;  %v3615_v25 = vpop.f32.mrf.mxu0 }
 0x5dc   : > { %v910_v26 = vpop.xlane.xlu1 %909 }
 0x5dd   : > { %v911_v27 = vmul.f32 0.03125, %v910_v26 }
 0x5df   : > { %v912_v28 = vsub.f32 %v4773_v22, %v911_v27 }
 0x5e1   : > { %v913_v29 = vmul.f32 %v912_v28, %v912_v28 }
 0x5e3   : > { %v914_v30 = vsel %vm587_vm0, %v913_v29, 0.0 }
 0x5e4   : > { %915 = vadd.xlane.f32.xlu1 %v914_v30  ;;  %v3360_v30 = vld [vmem:[#allocation11] ss:$0 sm:$0xff] }
 0x66d   : > { %v916_v35 = vpop.xlane.xlu1 %915 }
 0x66e   : > { %v917_v36 = vmul.f32 0.03125, %v916_v35 }
 0x670   : > { %v918_v37 = vadd.f32 1e-05, %v917_v36 }
 0x672   : > { %4053 = vrsqrt.f32 %v918_v37 }
 0x67f   : > { %v4054_v38 = vpop.eup %4053 }
 0x680   : > { %v920_v40 = vmul.f32 %v4054_v38, %v912_v28  ;;  %v3366_v38 = vld [vmem:[#allocation11 + $0x6] ss:$0 sm:$0xff] }
 0x682   : > { %v925_v42 = vmul.f32 %v3358_v39, %v920_v40  ;;  %v3367_v39 = vld [vmem:[#allocation11 + $0x7] ss:$0 sm:$0xff] }
 0x684   : > { %v930_v43 = vadd.f32 %v3359_v41, %v925_v42 }
 0x686   : > { %v4783_v46 = vpack.c.bf16 %v930_v43, %v930_v43 }
 0x688   : > { %3621 = vmatmul.mubr.msk.bf16.vlgmr.msra.gmra.mxu1 %vm587_vm0, %v4783_v46  ;;  %3629 = vmatmul.mubr.msk.bf16.vlgmr.msra.gmra.mxu0 %vm587_vm0, %v4783_v46 }
 0x689   : > { %3633 = vmatpush3.bf16.msra.mxu1 %v4005_v44  ;;  %3641 = vmatpush3.bf16.msra.mxu0 %v4006_v45 }
 0x68a   : > { %3634 = vmatprep.subr.bf16.mxu1 %v4432_v8  ;;  %3642 = vmatprep.subr.bf16.mxu0 %v4432_v8 }
 0x68b   : > { %3636 = vmatprep.mubr.msk.bf16.mxu1 %vm4433_vm1, %v4432_v8  ;;  %3644 = vmatprep.mubr.msk.bf16.mxu0 %vm4433_vm1, %v4432_v8 }
 0x68d   : > { %3635 = vmatpush3.bf16.msra.mxu1 %v4007_v47  ;;  %3643 = vmatpush3.bf16.msra.mxu0 %v4008_v48 }
 0x68e   : > { %3648 = vmatprep.subr.bf16.mxu1 %v4432_v8  ;;  %3656 = vmatprep.subr.bf16.mxu0 %v4432_v8 }
 0x690   : > { %3637 = vmatmul.mubr.msk.bf16.vlgmr.msra.gmra.mxu1 %vm587_vm0, %v4783_v46  ;;  %3645 = vmatmul.mubr.msk.bf16.vlgmr.msra.gmra.mxu0 %vm587_vm0, %v4783_v46 }
 0x691   : > { %3649 = vmatpush3.bf16.msra.mxu1 %v4009_v49  ;;  %3657 = vmatpush3.bf16.msra.mxu0 %v4010_v50 }
 0x692   : > { %3650 = vmatprep.subr.bf16.mxu1 %v4432_v8  ;;  %3658 = vmatprep.subr.bf16.mxu0 %v4432_v8 }
 0x693   : > { %3652 = vmatprep.mubr.msk.bf16.mxu1 %vm4433_vm1, %v4432_v8  ;;  %3660 = vmatprep.mubr.msk.bf16.mxu0 %vm4433_vm1, %v4432_v8 }
 0x695   : > { %3651 = vmatpush3.bf16.msra.mxu1 %v4011_v51  ;;  %3659 = vmatpush3.bf16.msra.mxu0 %v4012_v52  ;;  %v3362_v52 = vld [vmem:[#allocation11 + $0x2] ss:$0 sm:$0xff] }
 0x696   : > { %3664 = vmatprep.subr.bf16.mxu1 %v4432_v8  ;;  %3672 = vmatprep.subr.bf16.mxu0 %v4432_v8 }
 0x698   : > { %3653 = vmatmul.mubr.msk.bf16.vlgmr.msra.gmra.mxu1 %vm587_vm0, %v4783_v46  ;;  %3661 = vmatmul.mubr.msk.bf16.vlgmr.msra.gmra.mxu0 %vm587_vm0, %v4783_v46 }
 0x699   : > { %3665 = vmatpush3.bf16.msra.mxu1 %v4013_v53  ;;  %3673 = vmatpush3.bf16.msra.mxu0 %v4014_v54  ;;  %v3363_v53 = vld [vmem:[#allocation11 + $0x3] ss:$0 sm:$0xff] }
 0x69a   : > { %3666 = vmatprep.subr.bf16.mxu1 %v4432_v8  ;;  %3674 = vmatprep.subr.bf16.mxu0 %v4432_v8 }
 0x69b   : > { %3668 = vmatprep.mubr.msk.bf16.mxu1 %vm4433_vm1, %v4432_v8  ;;  %3676 = vmatprep.mubr.msk.bf16.mxu0 %vm4433_vm1, %v4432_v8 }
 0x69d   : > { %3667 = vmatpush3.bf16.msra.mxu1 %v4015_v55  ;;  %3675 = vmatpush3.bf16.msra.mxu0 %v4016_v56 }
 0x69e   : > { %3680 = vmatprep.subr.bf16.mxu1 %v4432_v8  ;;  %3688 = vmatprep.subr.bf16.mxu0 %v4432_v8 }
 0x6a0   : > { %3669 = vmatmul.mubr.msk.bf16.vlgmr.msra.gmra.mxu1 %vm587_vm0, %v4783_v46  ;;  %3677 = vmatmul.mubr.msk.bf16.vlgmr.msra.gmra.mxu0 %vm587_vm0, %v4783_v46 }
 0x6a1   : > { %3681 = vmatpush3.bf16.msra.mxu1 %v4017_v57  ;;  %3689 = vmatpush3.bf16.msra.mxu0 %v4018_v58 }
 0x6a2   : > { %3682 = vmatprep.subr.bf16.mxu1 %v4432_v8  ;;  %3690 = vmatprep.subr.bf16.mxu0 %v4432_v8 }
 0x6a3   : > { %3684 = vmatprep.mubr.msk.bf16.mxu1 %vm4433_vm1, %v4432_v8  ;;  %3692 = vmatprep.mubr.msk.bf16.mxu0 %vm4433_vm1, %v4432_v8 }
 0x6a5   : > { %3683 = vmatpush3.bf16.msra.mxu1 %v4019_v59  ;;  %3691 = vmatpush3.bf16.msra.mxu0 %v4020_v60  ;;  %v3368_v60 = vld [vmem:[#allocation11 + $0x8] ss:$0 sm:$0xff] }
 0x6a6   : > { %3696 = vmatprep.subr.bf16.mxu1 %v4432_v8  ;;  %3704 = vmatprep.subr.bf16.mxu0 %v4432_v8 }
 0x6a8   : > { %3685 = vmatmul.mubr.msk.bf16.vlgmr.msra.gmra.mxu1 %vm587_vm0, %v4783_v46  ;;  %3693 = vmatmul.mubr.msk.bf16.vlgmr.msra.gmra.mxu0 %vm587_vm0, %v4783_v46 }
 0x6a9   : > { %3697 = vmatpush3.bf16.msra.mxu1 %v4021_v61  ;;  %3705 = vmatpush3.bf16.msra.mxu0 %v4022_v62  ;;  %v3369_v61 = vld [vmem:[#allocation11 + $0x9] ss:$0 sm:$0xff] }
 0x6aa   : > { %3698 = vmatprep.subr.bf16.mxu1 %v4432_v8  ;;  %3706 = vmatprep.subr.bf16.mxu0 %v4432_v8 }
 0x6ab   : > { %3700 = vmatprep.mubr.msk.bf16.mxu1 %vm4433_vm1, %v4432_v8  ;;  %3708 = vmatprep.mubr.msk.bf16.mxu0 %vm4433_vm1, %v4432_v8 }
 0x6ad   : > { %3699 = vmatpush3.bf16.msra.mxu1 %v4023_v63  ;;  %3707 = vmatpush3.bf16.msra.mxu0 %v4024_v0 }
 0x6ae   : > { %3712 = vmatprep.subr.bf16.mxu1 %v4432_v8  ;;  %3718 = vmatprep.subr.bf16.mxu0 %v4432_v8 }
 0x6b0   : > { %3701 = vmatmul.mubr.msk.bf16.vlgmr.msra.gmra.mxu1 %vm587_vm0, %v4783_v46  ;;  %3709 = vmatmul.mubr.msk.bf16.vlgmr.msra.gmra.mxu0 %vm587_vm0, %v4783_v46 }
 0x6b1   : > { %3714 = vmatprep.mubr.msk.bf16.mxu1 %vm4433_vm1, %v4432_v8  ;;  %3720 = vmatprep.mubr.msk.bf16.mxu0 %vm4433_vm1, %v4432_v8 }
 0x748   : > { %v1113_v1 = vpop.f32.mrf.mxu1  ;;  %v1165_v2 = vpop.f32.mrf.mxu0 }
 0x749   : > { %v1114_v40 = vadd.f32 %v3360_v30, %v1113_v1  ;;  %v1166_v41 = vadd.f32 %v3361_v31, %v1165_v2 }
 0x74a   : > { %v3622_v3 = vpop.f32.mrf.mxu1  ;;  %v3630_v4 = vpop.f32.mrf.mxu0 }
 0x74b   : > { %v1691_v48 = vpack.c.bf16 %v1114_v40, %v1114_v40  ;;  %v1692_v49 = vpack.c.bf16 %v1166_v41, %v1166_v41 }
 0x74c   : > { %v1116_v5 = vpop.f32.mrf.mxu1  ;;  %v1168_v6 = vpop.f32.mrf.mxu0 }
 0x74e   : > { %v3623_v7 = vpop.f32.mrf.mxu1  ;;  %v3631_v9 = vpop.f32.mrf.mxu0 }
 0x750   : > { %v1217_v10 = vpop.f32.mrf.mxu1  ;;  %v1269_v12 = vpop.f32.mrf.mxu0 }
 0x751   : > { %v1218_v62 = vadd.f32 %v3362_v52, %v1217_v10  ;;  %v1270_v63 = vadd.f32 %v3363_v53, %v1269_v12 }
 0x752   : > { %v3638_v13 = vpop.f32.mrf.mxu1  ;;  %v3646_v14 = vpop.f32.mrf.mxu0 }
 0x753   : > { %v1693_v6 = vpack.c.bf16 %v1218_v62, %v1218_v62  ;;  %v1694_v7 = vpack.c.bf16 %v1270_v63, %v1270_v63 }
 0x754   : > { %v1220_v15 = vpop.f32.mrf.mxu1  ;;  %v1272_v16 = vpop.f32.mrf.mxu0 }
 0x756   : > { %v3639_v17 = vpop.f32.mrf.mxu1  ;;  %v3647_v18 = vpop.f32.mrf.mxu0 }
 0x758   : > { %v1321_v21 = vpop.f32.mrf.mxu1  ;;  %v1373_v23 = vpop.f32.mrf.mxu0 }
 0x759   : > { %v1322_v24 = vadd.f32 %v3364_v19, %v1321_v21  ;;  %v1374_v25 = vadd.f32 %v3365_v20, %v1373_v23 }
 0x75a   : > { %v3654_v26 = vpop.f32.mrf.mxu1  ;;  %v3662_v27 = vpop.f32.mrf.mxu0 }
 0x75b   : > { %v1695_v28 = vpack.c.bf16 %v1322_v24, %v1322_v24  ;;  %v1696_v29 = vpack.c.bf16 %v1374_v25, %v1374_v25 }
 0x75c   : > { %v1324_v32 = vpop.f32.mrf.mxu1  ;;  %v1376_v33 = vpop.f32.mrf.mxu0 }
 0x75d   : > { %v1704_v34 = vsel %vm1699_vm5, %v1695_v28, 0  ;;  %v1750_v35 = vsel %vm1699_vm5, %v1696_v29, 0 }
 0x75e   : > { %v3655_v36 = vpop.f32.mrf.mxu1  ;;  %v3663_v37 = vpop.f32.mrf.mxu0  ;;  %3713 = vmatpush3.bf16.xpose.msra.mxu1 %v1704_v34  ;;  %3719 = vmatpush3.bf16.xpose.msra.mxu0 %v1750_v35 }
 0x75f   : > { %3724 = vmatprep.subr.bf16.mxu1 %v4432_v8  ;;  %3730 = vmatprep.subr.bf16.mxu0 %v4432_v8 }
 0x760   : > { %v1425_v42 = vpop.f32.mrf.mxu1  ;;  %v1477_v43 = vpop.f32.mrf.mxu0 }
 0x761   : > { %v1426_v44 = vadd.f32 %v3366_v38, %v1425_v42  ;;  %v1478_v45 = vadd.f32 %v3367_v39, %v1477_v43 }
 0x762   : > { %v3670_v46 = vpop.f32.mrf.mxu1  ;;  %v3678_v47 = vpop.f32.mrf.mxu0 }
 0x763   : > { %v1697_v50 = vpack.c.bf16 %v1426_v44, %v1426_v44  ;;  %v1698_v51 = vpack.c.bf16 %v1478_v45, %v1478_v45 }
 0x764   : > { %v1428_v54 = vpop.f32.mrf.mxu1  ;;  %v1480_v55 = vpop.f32.mrf.mxu0 }
 0x765   : > { %v1796_v56 = vsel %vm1699_vm5, %v1697_v50, 0  ;;  %v1842_v57 = vsel %vm1699_vm5, %v1698_v51, 0  ;;  %3715 = vmatmul.mubr.msk.bf16.vlgmr.msra.gmra.mxu1 %vm1699_vm5, %v1691_v48  ;;  %3721 = vmatmul.mubr.msk.bf16.vlgmr.msra.gmra.mxu0 %vm1699_vm5, %v1692_v49 }
 0x766   : > { %v3671_v58 = vpop.f32.mrf.mxu1  ;;  %v3679_v59 = vpop.f32.mrf.mxu0  ;;  %3725 = vmatpush3.bf16.xpose.msra.mxu1 %v1796_v56  ;;  %3731 = vmatpush3.bf16.xpose.msra.mxu0 %v1842_v57 }
 0x767   : > { %3726 = vmatprep.mubr.msk.bf16.mxu1 %vm4433_vm1, %v4432_v8  ;;  %3732 = vmatprep.mubr.msk.bf16.mxu0 %vm4433_vm1, %v4432_v8 }
 0x768   : > { %v1529_v0 = vpop.f32.mrf.mxu1  ;;  %v1581_v1 = vpop.f32.mrf.mxu0  ;;  %3736 = vmatprep.subr.bf16.mxu1 %v4432_v8  ;;  %3742 = vmatprep.subr.bf16.mxu0 %v4432_v8 }
 0x769   : > { %v1530_v2 = vadd.f32 %v3368_v60, %v1529_v0  ;;  %v1582_v3 = vadd.f32 %v3369_v61, %v1581_v1 }
 0x76a   : > { %v3686_v4 = vpop.f32.mrf.mxu1  ;;  %v3694_v5 = vpop.f32.mrf.mxu0 }
 0x76b   : > { %v1936_v9 = vpack.c.bf16 %v1530_v2, %v1530_v2  ;;  %v1937_v10 = vpack.c.bf16 %v1582_v3, %v1582_v3 }
 0x76c   : > { %v1532_v12 = vpop.f32.mrf.mxu1  ;;  %v1584_v13 = vpop.f32.mrf.mxu0 }
 0x76d   : > { %v1945_v14 = vsel %vm1943_vm6, %v1936_v9, 0  ;;  %v1991_v15 = vsel %vm1943_vm6, %v1937_v10, 0  ;;  %3727 = vmatmul.mubr.msk.bf16.vlgmr.msra.gmra.mxu1 %vm1699_vm5, %v1693_v6  ;;  %3733 = vmatmul.mubr.msk.bf16.vlgmr.msra.gmra.mxu0 %vm1699_vm5, %v1694_v7  ;;  %v3370_v10 = vld [vmem:[#allocation11 + $0xa] ss:$0 sm:$0xff]  ;;  %v3371_v13 = vld [vmem:[#allocation11 + $0xb] ss:$0 sm:$0xff] }
 0x76e   : > { %v3687_v16 = vpop.f32.mrf.mxu1  ;;  %v3695_v17 = vpop.f32.mrf.mxu0  ;;  %3737 = vmatpush3.bf16.msra.mxu1 %v1945_v14  ;;  %3743 = vmatpush3.bf16.msra.mxu0 %v1991_v15 }
 0x76f   : > { %3738 = vmatprep.mubr.msk.bf16.mxu1 %vm4433_vm1, %v4432_v8  ;;  %3744 = vmatprep.mubr.msk.bf16.mxu0 %vm4433_vm1, %v4432_v8 }
 0x770   : > { %v4875_v18 = vpop.f32.mrf.mxu1  ;;  %v4877_v19 = vpop.f32.mrf.mxu0  ;;  %3748 = vmatprep.subr.bf16.mxu1 %v4432_v8  ;;  %3754 = vmatprep.subr.bf16.mxu0 %v4432_v8 }
 0x771   : > { %v1634_v15 = vadd.f32 %v3370_v10, %v4875_v18  ;;  %v1686_v16 = vadd.f32 %v3371_v13, %v4877_v19  ;;  %v2125_v19 = vld [vmem:[#allocation13] sm:$0xf] }
 0x772   : > { %v3702_v20 = vpop.f32.mrf.mxu1  ;;  %v3710_v21 = vpop.f32.mrf.mxu0 }
 0x773   : > { %v1938_v21 = vpack.c.bf16 %v1634_v15, %v1634_v15 }
 0x774   : > { %v1636_v23 = vpop.f32.mrf.mxu1  ;;  %v1688_v24 = vpop.f32.mrf.mxu0 }
 0x775   : > { %v1939_v24 = vpack.c.bf16 %v1686_v16, %v1686_v16 }
 0x776   : > { %v3703_v25 = vpop.f32.mrf.mxu1  ;;  %v3711_v26 = vpop.f32.mrf.mxu0 }
 0x825   : > { %v1740_v27 = vpop.f32.mrf.mxu1  ;;  %v1786_v28 = vpop.f32.mrf.mxu0 }
 0x826   : > { %v1884_v29 = vmul.f32 0.35355338, %v1740_v27  ;;  %v1885_v30 = vmul.f32 0.35355338, %v1786_v28  ;;  %v2037_v28 = vsel %vm1943_vm6, %v1938_v21, 0 }
 0x827   : > { %v3716_v31 = vpop.f32.mrf.mxu1  ;;  %v3722_v32 = vpop.f32.mrf.mxu0 }
 0x828   : > { %v1888_v33 = vsel %vm1699_vm5, %v1884_v29, -inf  ;;  %v1891_v34 = vsel %vm1699_vm5, %v1885_v30, -inf  ;;  %v2126_v32 = vld [vmem:[#allocation13 + $0x4] sm:$0xf] }
 0x829   : > { %1889 = vmax.xlane.f32.xlu0 %v1888_v33  ;;  %v1743_v35 = vpop.f32.mrf.mxu1  ;;  %1892 = vmax.xlane.f32.xlu1 %v1891_v34  ;;  %v1789_v36 = vpop.f32.mrf.mxu0 }
 0x82a   : > { %v2137_v35 = vsel %vm1943_vm6, %v2125_v19, 0 }
 0x82b   : > { %v3717_v37 = vpop.f32.mrf.mxu1  ;;  %v3723_v38 = vpop.f32.mrf.mxu0 }
 0x82c   : > { %v2183_v37 = vsel %vm1943_vm6, %v2126_v32, 0  ;;  %v2127_v38 = vld [vmem:[#allocation13 + $0x8] sm:$0xf] }
 0x82d   : > { %v1832_v39 = vpop.f32.mrf.mxu1  ;;  %v1878_v40 = vpop.f32.mrf.mxu0 }
 0x82e   : > { %v1886_v41 = vmul.f32 0.35355338, %v1832_v39  ;;  %v1887_v42 = vmul.f32 0.35355338, %v1878_v40  ;;  %v2128_v39 = vld [vmem:[#allocation13 + $0xc] sm:$0xf] }
 0x82f   : > { %v3728_v43 = vpop.f32.mrf.mxu1  ;;  %v3734_v44 = vpop.f32.mrf.mxu0 }
 0x830   : > { %v1894_v45 = vsel %vm1699_vm5, %v1886_v41, -inf  ;;  %v1897_v46 = vsel %vm1699_vm5, %v1887_v42, -inf  ;;  %v2229_v43 = vsel %vm1943_vm6, %v2127_v38, 0 }
 0x831   : > { %1895 = vmax.xlane.f32.xlu0 %v1894_v45  ;;  %v1835_v47 = vpop.f32.mrf.mxu1  ;;  %1898 = vmax.xlane.f32.xlu1 %v1897_v46  ;;  %v1881_v48 = vpop.f32.mrf.mxu0  ;;  %v2275_v46 = vsel %vm1943_vm6, %v2128_v39, 0 }
 0x833   : > { %v3729_v49 = vpop.f32.mrf.mxu1  ;;  %v3735_v50 = vpop.f32.mrf.mxu0 }
 0x8b2   : > { %v1890_v51 = vpop.xlane.xlu0 %1889  ;;  %v1893_v52 = vpop.xlane.xlu1 %1892 }
 0x8b3   : > { %v1900_v53 = vsub.f32 %v1884_v29, %v1890_v51  ;;  %v1901_v54 = vsub.f32 %v1885_v30, %v1893_v52  ;;  %v2083_v29 = vsel %vm1943_vm6, %v1939_v24, 0 }
 0x8b5   : > { %v1904_v55 = vmul.f32 1.442695, %v1900_v53  ;;  %v1906_v56 = vmul.f32 1.442695, %v1901_v54 }
 0x8b7   : > { %4055 = vpow2.f32 %v1904_v55 }
 0x8b8   : > { %4057 = vpow2.f32 %v1906_v56 }
 0x8ba   : > { %v1896_v57 = vpop.xlane.xlu0 %1895  ;;  %v1899_v58 = vpop.xlane.xlu1 %1898 }
 0x8bb   : > { %v1902_v59 = vsub.f32 %v1886_v41, %v1896_v57  ;;  %v1903_v60 = vsub.f32 %v1887_v42, %v1899_v58 }
 0x8bd   : > { %v1908_v61 = vmul.f32 1.442695, %v1902_v59  ;;  %v1910_v62 = vmul.f32 1.442695, %v1903_v60 }
 0x8bf   : > { %4059 = vpow2.f32 %v1908_v61 }
 0x8c0   : > { %4061 = vpow2.f32 %v1910_v62  ;;  %v4025_v62 = vld [vmem:[%s5067_s11 + $0x18] sm:$0xff]  }
 0x8c4   : > { %v4056_v63 = vpop.eup %4055 }
 0x8c5   : > { %v4058_v0 = vpop.eup %4057  ;;  %v1912_v1 = vsel %vm1699_vm5, %v4056_v63, 0.0 }
 0x8c6   : > { %1913 = vadd.xlane.f32.xlu0 %v1912_v1  ;;  %v1915_v2 = vsel %vm1699_vm5, %v4058_v0, 0.0 }
 0x8c7   : > { %1916 = vadd.xlane.f32.xlu1 %v1915_v2 }
 0x8cc   : > { %v4060_v3 = vpop.eup %4059 }
 0x8cd   : > { %v4062_v4 = vpop.eup %4061  ;;  %v1918_v5 = vsel %vm1699_vm5, %v4060_v3, 0.0 }
 0x8ce   : > { %1919 = vadd.xlane.f32.xlu0 %v1918_v5  ;;  %v1921_v6 = vsel %vm1699_vm5, %v4062_v4, 0.0 }
 0x8cf   : > { %1922 = vadd.xlane.f32.xlu1 %v1921_v6 }
 0x94f   : > { %v1914_v7 = vpop.xlane.xlu0 %1913 }
 0x950   : > { %4063 = vrcp.f32 %v1914_v7  ;;  %v1917_v9 = vpop.xlane.xlu1 %1916 }
 0x951   : > { %4065 = vrcp.f32 %v1917_v9 }
 0x957   : > { %v1920_v12 = vpop.xlane.xlu0 %1919 }
 0x958   : > { %4067 = vrcp.f32 %v1920_v12  ;;  %v1923_v14 = vpop.xlane.xlu1 %1922 }
 0x959   : > { %4069 = vrcp.f32 %v1923_v14 }
 0x95d   : > { %v4064_v17 = vpop.eup %4063 }
 0x95e   : > { %v4066_v20 = vpop.eup %4065  ;;  %v1925_v23 = vmul.f32 %v4064_v17, %v4056_v63  ;;  %v4026_v63 = vld [vmem:[%s5067_s11 + $0x10] sm:$0xff]  }
 0x95f   : > { %v1927_v25 = vmul.f32 %v4066_v20, %v4058_v0 }
 0x960   : > { %v1932_v26 = vpack.c.bf16 %v1925_v23, %v1925_v23 }
 0x961   : > { %v1933_v27 = vpack.c.bf16 %v1927_v25, %v1927_v25  ;;  %v3420_v25 = vld [vmem:[#allocation5 + $0x5] ss:$0 sm:$0xff] }
 0x962   : > { %3739 = vmatmul.mubr.msk.bf16.vlgmr.msra.gmra.mxu1 %vm1699_vm5, %v1932_v26 }
 0x963   : > { %3745 = vmatmul.mubr.msk.bf16.vlgmr.msra.gmra.mxu0 %vm1699_vm5, %v1933_v27  ;;  %3749 = vmatpush3.bf16.msra.mxu1 %v2037_v28 }
 0x964   : > { %3755 = vmatpush3.bf16.msra.mxu0 %v2083_v29  ;;  %3750 = vmatprep.mubr.msk.bf16.mxu1 %vm4433_vm1, %v4432_v8 }
 0x965   : > { %v4068_v18 = vpop.eup %4067  ;;  %3756 = vmatprep.mubr.msk.bf16.mxu0 %vm4433_vm1, %v4432_v8  ;;  %3760 = vmatprep.subr.bf16.mxu1 %v4432_v8 }
 0x966   : > { %v4070_v30 = vpop.eup %4069  ;;  %v1929_v31 = vmul.f32 %v4068_v18, %v4060_v3  ;;  %3766 = vmatprep.subr.bf16.mxu0 %v4432_v8 }
 0x967   : > { %v1931_v33 = vmul.f32 %v4070_v30, %v4062_v4  ;;  %v4027_v30 = vld [vmem:[%s5068_s12 + $0x8] sm:$0xff]  }
 0x968   : > { %v1934_v34 = vpack.c.bf16 %v1929_v31, %v1929_v31 }
 0x969   : > { %v1935_v36 = vpack.c.bf16 %v1931_v33, %v1931_v33 }
 0x96a   : > { %3751 = vmatmul.mubr.msk.bf16.vlgmr.msra.gmra.mxu1 %vm1699_vm5, %v1934_v34 }
 0x96b   : > { %3757 = vmatmul.mubr.msk.bf16.vlgmr.msra.gmra.mxu0 %vm1699_vm5, %v1935_v36  ;;  %3761 = vmatpush3.bf16.msra.mxu1 %v2137_v35 }
 0x96c   : > { %3767 = vmatpush3.bf16.msra.mxu0 %v2183_v37  ;;  %3762 = vmatprep.mubr.msk.bf16.mxu1 %vm4433_vm1, %v4432_v8 }
 0x96d   : > { %3768 = vmatprep.mubr.msk.bf16.mxu0 %vm4433_vm1, %v4432_v8  ;;  %3772 = vmatprep.subr.bf16.mxu1 %v4432_v8 }
 0x96e   : > { %3778 = vmatprep.subr.bf16.mxu0 %v4432_v8 }
 0xa22   : > { %v1981_v40 = vpop.f32.mrf.mxu1 }
 0xa23   : > { %v2129_v41 = vpack.c.bf16 %v1981_v40, %v1981_v40  ;;  %v2027_v42 = vpop.f32.mrf.mxu0 }
 0xa24   : > { %v2130_v44 = vpack.c.bf16 %v2027_v42, %v2027_v42  ;;  %v3740_v45 = vpop.f32.mrf.mxu1 }
 0xa25   : > { %v3746_v47 = vpop.f32.mrf.mxu0  ;;  %3763 = vmatmul.mubr.msk.bf16.vlgmr.msra.gmra.mxu1 %vm1699_vm5, %v2129_v41 }
 0xa26   : > { %3769 = vmatmul.mubr.msk.bf16.vlgmr.msra.gmra.mxu0 %vm1699_vm5, %v2130_v44  ;;  %v1984_v48 = vpop.f32.mrf.mxu1  ;;  %3773 = vmatpush3.bf16.msra.mxu1 %v2229_v43 }
 0xa27   : > { %v2030_v49 = vpop.f32.mrf.mxu0  ;;  %3779 = vmatpush3.bf16.msra.mxu0 %v2275_v46  ;;  %3774 = vmatprep.mubr.msk.bf16.mxu1 %vm4433_vm1, %v4432_v8 }
 0xa28   : > { %v3741_v50 = vpop.f32.mrf.mxu1  ;;  %3780 = vmatprep.mubr.msk.bf16.mxu0 %vm4433_vm1, %v4432_v8  ;;  %3784 = vmatprep.subr.bf16.mxu1 %v4432_v8 }
 0xa29   : > { %v3747_v51 = vpop.f32.mrf.mxu0  ;;  %3792 = vmatprep.subr.bf16.mxu0 %v4432_v8 }
 0xa2a   : > { %v2073_v52 = vpop.f32.mrf.mxu1 }
 0xa2b   : > { %v2131_v53 = vpack.c.bf16 %v2073_v52, %v2073_v52  ;;  %v2119_v54 = vpop.f32.mrf.mxu0 }
 0xa2c   : > { %v2132_v55 = vpack.c.bf16 %v2119_v54, %v2119_v54  ;;  %v3752_v56 = vpop.f32.mrf.mxu1 }
 0xa2d   : > { %v3758_v57 = vpop.f32.mrf.mxu0  ;;  %3775 = vmatmul.mubr.msk.bf16.vlgmr.msra.gmra.mxu1 %vm1699_vm5, %v2131_v53 }
 0xa2e   : > { %3781 = vmatmul.mubr.msk.bf16.vlgmr.msra.gmra.mxu0 %vm1699_vm5, %v2132_v55  ;;  %v2076_v58 = vpop.f32.mrf.mxu1  ;;  %3788 = vmatprep.mubr.msk.bf16.mxu1 %vm4433_vm1, %v4432_v8 }
 0xa2f   : > { %v2122_v59 = vpop.f32.mrf.mxu0  ;;  %3794 = vmatprep.mubr.msk.bf16.mxu0 %vm4433_vm1, %v4432_v8  ;;  %3785 = vmatpush3.bf16.msra.mxu1 %v4025_v62  ;;  %v3431_v62 = vld [vmem:[#allocation5 + $0x10] ss:$0 sm:$0xff] }
 0xa30   : > { %v3753_v60 = vpop.f32.mrf.mxu1  ;;  %3786 = vmatprep.subr.bf16.mxu1 %v4432_v8  ;;  %3793 = vmatpush3.bf16.msra.mxu0 %v4027_v30 }
 0xa31   : > { %v3759_v61 = vpop.f32.mrf.mxu0  ;;  %3806 = vmatprep.subr.bf16.mxu0 %v4432_v8 }
 0xa33   : > { %3787 = vmatpush3.bf16.msra.mxu1 %v4026_v63 }
 0xa34   : > { %3798 = vmatprep.subr.bf16.mxu1 %v4432_v8 }
 0xae5   : > { %v2173_v0 = vpop.f32.mrf.mxu1 }
 0xae6   : > { %v2219_v1 = vpop.f32.mrf.mxu0  ;;  %v2317_v5 = vsel %vm587_vm0, %v2173_v0, 0.0 }
 0xae7   : > { %v3764_v2 = vpop.f32.mrf.mxu1  ;;  %v2318_v6 = vsel %vm587_vm0, %v2219_v1, 0.0 }
 0xae8   : > { %v3770_v3 = vpop.f32.mrf.mxu0  ;;  %v2319_v12 = vadd.f32 %v2318_v6, %v2317_v5 }
 0xae9   : > { %v2176_v4 = vpop.f32.mrf.mxu1 }
 0xaea   : > { %v2222_v7 = vpop.f32.mrf.mxu0 }
 0xaeb   : > { %v3765_v9 = vpop.f32.mrf.mxu1 }
 0xaec   : > { %v3771_v10 = vpop.f32.mrf.mxu0 }
 0xaed   : > { %v2265_v13 = vpop.f32.mrf.mxu1 }
 0xaee   : > { %v2320_v14 = vsel %vm587_vm0, %v2265_v13, 0.0  ;;  %v2311_v15 = vpop.f32.mrf.mxu0  ;;  %v4028_v13 = vld [vmem:[#allocation14 + $0x8] sm:$0xff]  }
 0xaef   : > { %v2321_v16 = vadd.f32 %v2320_v14, %v2319_v12  ;;  %v3776_v17 = vpop.f32.mrf.mxu1  ;;  %v2322_v20 = vsel %vm587_vm0, %v2311_v15, 0.0  ;;  %v4029_v14 = vld [vmem:[#allocation14 + $0x18] sm:$0xff]   ;;  %v4030_v15 = vld [vmem:[#allocation14] sm:$0xff]  }
 0xaf0   : > { %v3782_v21 = vpop.f32.mrf.mxu0 }
 0xaf1   : > { %v2323_v23 = vadd.f32 %v2322_v20, %v2321_v16  ;;  %v2268_v24 = vpop.f32.mrf.mxu1  ;;  %v4031_v16 = vld [vmem:[#allocation14 + $0x10] sm:$0xff]  }
 0xaf2   : > { %v2314_v26 = vpop.f32.mrf.mxu0  ;;  %v3434_v24 = vld [vmem:[#allocation5 + $0x6] ss:$0 sm:$0xff] }
 0xaf3   : > { %v2324_v27 = vadd.f32 %v2323_v23, %v4773_v22  ;;  %v3777_v28 = vpop.f32.mrf.mxu1  ;;  %v3425_v22 = vld [vmem:[%s5059_s3 + $0x1] ss:$0 sm:$0xff]  ;;  %v3435_v26 = vld [vmem:[#allocation5 + $0x7] ss:$0 sm:$0xff] }
 0xaf4   : > { %v3783_v29 = vpop.f32.mrf.mxu0 }
 0xaf5   : > { %v2330_v18 = vadd.f32 %v3420_v25, %v2324_v27 }
 0xaf7   : > { %v2336_v19 = vpack.c.bf16 %v2330_v18, %v2330_v18 }
 0xaf9   : > { %3789 = vmatmul.mubr.msk.bf16.vlgmr.msra.gmra.mxu1 %vm587_vm0, %v2336_v19  ;;  %v4033_v19 = vld [vmem:[#allocation14 + $0x20] sm:$0xff]  }
 0xafa   : > { %3802 = vmatprep.mubr.msk.bf16.mxu1 %vm4433_vm1, %v4432_v8  ;;  %3799 = vmatpush3.bf16.msra.mxu1 %v4028_v13 }
 0xafb   : > { %3800 = vmatprep.subr.bf16.mxu1 %v4432_v8 }
 0xafe   : > { %3801 = vmatpush3.bf16.msra.mxu1 %v4030_v15 }
 0xaff   : > { %3814 = vmatprep.subr.bf16.mxu1 %v4432_v8 }
 0xbb9   : > { %v2391_v31 = vpop.f32.mrf.mxu1 }
 0xbba   : > { %v2392_v32 = vadd.f32 %v3425_v22, %v2391_v31 }
 0xbbb   : > { %v3790_v33 = vpop.f32.mrf.mxu1 }
 0xbbc   : > { %v2398_v34 = vmul.f32 0.70710677, %v2392_v32  ;;  %v2397_v58 = vmul.f32 0.5, %v2392_v32 }
 0xbbd   : > { %v2394_v35 = vpop.f32.mrf.mxu1 }
 0xbbe   : > { %v2401_v36 = vand.u32 2147483647, %v2398_v34  ;;  %vm2399_vm7 = vcmp.ge.f32.partialorder %v2398_v34, 0.0 }
 0xbbf   : > { %v3791_v37 = vpop.f32.mrf.mxu1  ;;  %v2400_v56 = vsel %vm2399_vm7, 1.0, %v4434_v11 }
 0xbc0   : > { %v2402_v38 = vmul.f32 0.3275911, %v2401_v36  ;;  %v2415_v40 = vsub.f32 0.0, %v2401_v36 }
 0xbc2   : > { %v2403_v39 = vadd.f32 1.0, %v2402_v38  ;;  %v2416_v41 = vmul.f32 %v2415_v40, %v2401_v36  ;;  %v2639_v40 = vlaneseq }
 0xbc4   : > { %4071 = vrcp.f32 %v2403_v39  ;;  %v2417_v44 = vmul.f32 1.442695, %v2416_v41  ;;  %v2640_v41 = vshrl.u32 %v2639_v40, 7 }
 0xbc6   : > { %4073 = vpow2.f32 %v2417_v44  ;;  %v2646_v44 = vsub.s32 1, %v2640_v41 }
 0xbd1   : > { %v4072_v42 = vpop.eup %4071 }
 0xbd2   : > { %v2406_v43 = vmul.f32 1.0614054, %v4072_v42 }
 0xbd3   : > { %v4074_v53 = vpop.eup %4073 }
 0xbd4   : > { %v2407_v45 = vadd.f32 -1.4531521, %v2406_v43 }
 0xbd6   : > { %v2408_v46 = vmul.f32 %v4072_v42, %v2407_v45  ;;  %v2660_v45 = vsub.s32 2, %v2640_v41 }
 0xbd8   : > { %v2409_v47 = vadd.f32 1.4214138, %v2408_v46  ;;  %v2638_v46 = vld [vmem:[#allocation16] sm:$0x1f] }
 0xbda   : > { %v2410_v48 = vmul.f32 %v4072_v42, %v2409_v47  ;;  %v2674_v47 = vsub.s32 3, %v2640_v41 }
 0xbdc   : > { %v2411_v49 = vadd.f32 -0.28449672, %v2410_v48  ;;  %v2688_v48 = vsub.s32 4, %v2640_v41 }
 0xbde   : > { %v2412_v50 = vmul.f32 %v4072_v42, %v2411_v49 }
 0xbe0   : > { %v2413_v51 = vadd.f32 0.2548296, %v2412_v50 }
 0xbe2   : > { %v2414_v52 = vmul.f32 %v4072_v42, %v2413_v51  ;;  %v2705_v42 = vld [vmem:[#allocation5 + $0xb] sm:$0x1]  ;;  %v2641_v51 = vsub.s32 0, %v2640_v41 }
 0xbe3   : > { %v2706_v43 = vadd.f32 1e-05, %v2705_v42 }
 0xbe4   : > { %v2419_v54 = vmul.f32 %v4074_v53, %v2414_v52  ;;  %v2647_v52 = vrot.slane %v2638_v46, %v2646_v44  ;;  %v2661_v53 = vrot.slane %v2638_v46, %v2660_v45 }
 0xbe6   : > { %v2420_v55 = vsub.f32 1.0, %v2419_v54 }
 0xbe8   : > { %v2421_v57 = vmul.f32 %v2420_v55, %v2400_v56  ;;  %v2675_v55 = vrot.slane %v2638_v46, %v2674_v47  ;;  %v2689_v56 = vrot.slane %v2638_v46, %v2688_v48 }
 0xbea   : > { %v2422_v59 = vadd.f32 1.0, %v2421_v57 }
 0xbec   : > { %v2423_v60 = vmul.f32 %v2422_v59, %v2397_v58  ;;  %v2642_v59 = vrot.slane %v2638_v46, %v2641_v51 }
 0xbee   : > { %v2427_v61 = vpack.c.bf16 %v2423_v60, %v2423_v60 }
 0xbf0   : > { %3795 = vmatmul.mubr.msk.bf16.vlgmr.msra.gmra.mxu0 %vm861_vm4, %v2427_v61 }
 0xbf1   : > { %3810 = vmatprep.mubr.msk.bf16.mxu0 %vm4433_vm1, %v4432_v8  ;;  %3807 = vmatpush3.bf16.msra.mxu0 %v4029_v14 }
 0xbf2   : > { %3808 = vmatprep.subr.bf16.mxu0 %v4432_v8 }
 0xbf5   : > { %3809 = vmatpush3.bf16.msra.mxu0 %v4031_v16 }
 0xbf6   : > { %3822 = vmatprep.subr.bf16.mxu0 %v4432_v8 }
 0xcb0   : > { %v2476_v63 = vpop.f32.mrf.mxu0 }
 0xcb1   : > { %v2477_v0 = vadd.f32 %v3431_v62, %v2476_v63 }
 0xcb2   : > { %v3796_v1 = vpop.f32.mrf.mxu0 }
 0xcb3   : > { %v4954_v2 = vadd.f32 %v2477_v0, %v2330_v18  ;;  %v4032_v18 = vld [vmem:[#allocation14 + $0x28] sm:$0xff]  }
 0xcb4   : > { %v2479_v3 = vpop.f32.mrf.mxu0 }
 0xcb5   : > { %v2485_v4 = vsel %vm587_vm0, %v4954_v2, 0.0 }
 0xcb6   : > { %2486 = vadd.xlane.f32.xlu0 %v2485_v4  ;;  %v3797_v5 = vpop.f32.mrf.mxu0 }
 0xd3f   : > { %v2487_v6 = vpop.xlane.xlu0 %2486 }
 0xd40   : > { %v2488_v7 = vmul.f32 0.03125, %v2487_v6 }
 0xd42   : > { %v2489_v9 = vsub.f32 %v4954_v2, %v2488_v7 }
 0xd44   : > { %v2490_v10 = vmul.f32 %v2489_v9, %v2489_v9 }
 0xd46   : > { %v2491_v12 = vsel %vm587_vm0, %v2490_v10, 0.0 }
 0xd47   : > { %2492 = vadd.xlane.f32.xlu1 %v2491_v12 }
 0xdd0   : > { %v2493_v17 = vpop.xlane.xlu1 %2492 }
 0xdd1   : > { %v2494_v20 = vmul.f32 0.03125, %v2493_v17 }
 0xdd3   : > { %v2495_v21 = vadd.f32 1e-05, %v2494_v20 }
 0xdd5   : > { %4075 = vrsqrt.f32 %v2495_v21 }
 0xde2   : > { %v4076_v23 = vpop.eup %4075 }
 0xde3   : > { %v2497_v25 = vmul.f32 %v4076_v23, %v2489_v9 }
 0xde5   : > { %v2502_v27 = vmul.f32 %v3434_v24, %v2497_v25 }
 0xde7   : > { %v2507_v28 = vadd.f32 %v3435_v26, %v2502_v27  ;;  %v3443_v27 = vld [vmem:[#allocation5 + $0xa] ss:$0 sm:$0xff] }
 0xde9   : > { %v2508_v29 = vpack.c.bf16 %v2507_v28, %v2507_v28 }
 0xdeb   : > { %3803 = vmatmul.mubr.msk.bf16.vlgmr.msra.gmra.mxu1 %vm587_vm0, %v2508_v29  ;;  %3811 = vmatmul.mubr.msk.bf16.vlgmr.msra.gmra.mxu0 %vm587_vm0, %v2508_v29 }
 0xdec   : > { %3818 = vmatprep.mubr.msk.bf16.mxu1 %vm4433_vm1, %v4432_v8  ;;  %3826 = vmatprep.mubr.msk.bf16.mxu0 %vm4433_vm1, %v4432_v8 }
 0xded   : > { %3815 = vmatpush3.bf16.msra.mxu1 %v4032_v18 }
 0xdee   : > { %3816 = vmatprep.subr.bf16.mxu1 %v4432_v8 }
 0xdf1   : > { %3817 = vmatpush3.bf16.msra.mxu1 %v4033_v19  ;;  %v3444_v19 = vld [vmem:[#allocation5 + $0x8] ss:$0 sm:$0xff] }
 0xdf2   : > { %3830 = vmatprep.subr.bf16.mxu1 %v4432_v8 }
 0xeab   : > { %v2562_v30 = vpop.f32.mrf.mxu1  ;;  %v2619_v22 = vpop.f32.mrf.mxu0 }
 0xeac   : > { %v3442_v31 = vmul.f32 -1.442695, %v2619_v22  ;;  %v3445_v22 = vld [vmem:[#allocation5 + $0x9] ss:$0 sm:$0xff] }
 0xead   : > { %v3804_v32 = vpop.f32.mrf.mxu1  ;;  %v3812_v33 = vpop.f32.mrf.mxu0 }
 0xeae   : > { %4077 = vpow2.f32 %v3442_v31 }
 0xeaf   : > { %v2565_v34 = vpop.f32.mrf.mxu1  ;;  %v2622_v35 = vpop.f32.mrf.mxu0 }
 0xeb1   : > { %v3805_v36 = vpop.f32.mrf.mxu1  ;;  %v3813_v37 = vpop.f32.mrf.mxu0 }
 0xebb   : > { %v4078_v38 = vpop.eup %4077 }
 0xebc   : > { %v2628_v39 = vadd.f32 1.0, %v4078_v38 }
 0xebe   : > { %4079 = vrcp.f32 %v2628_v39 }
 0xebf   : > { %4081 = vrsqrt.f32 %v2706_v43 }
 0xecb   : > { %v4080_v49 = vpop.eup %4079 }
 0xecc   : > { %v2631_v50 = vmul.f32 %v4080_v49, %v2562_v30  ;;  %v4082_v23 = vpop.eup %4081 }
 0xecd   : > { %v2711_v29 = vrot.slane %v4082_v23, %v2641_v51  ;;  %v4035_v51 = vld [vmem:[#allocation7 + $0x10] sm:$0xff]  }
 0xece   : > { %v2633_v54 = vrot.slane %v2631_v50, 6  ;;  %v4034_v50 = vld [vmem:[#allocation7 + $0x18] sm:$0xff]  }
 0xecf   : > { %3823 = vmatpush3.bf16.msra.mxu0 %v4034_v50 }
 0xed0   : > { %v2636_v57 = vsel %vm2635_vm8, 0.0, %v2633_v54  ;;  %v2637_v58 = vsel %vm2635_vm8, %v2633_v54, 0.0  ;;  %3824 = vmatprep.subr.bf16.mxu0 %v4432_v8 }
 0xed1   : > { %v2648_v60 = vmul.f32 %v2647_v52, %v2636_v57  ;;  %v2649_v61 = vmul.f32 %v2647_v52, %v2637_v58  ;;  %v2662_v62 = vmul.f32 %v2661_v53, %v2636_v57  ;;  %v2663_v63 = vmul.f32 %v2661_v53, %v2637_v58 }
 0xed2   : > { %v2676_v0 = vmul.f32 %v2675_v55, %v2636_v57  ;;  %v2677_v1 = vmul.f32 %v2675_v55, %v2637_v58  ;;  %v2690_v3 = vmul.f32 %v2689_v56, %v2636_v57  ;;  %v2691_v4 = vmul.f32 %v2689_v56, %v2637_v58  ;;  %v3450_v55 = vld [vmem:[#allocation5 + $0xc] ss:$0 sm:$0xff] }
 0xed3   : > { %v2653_v5 = vrot.slane %v2648_v60, 1  ;;  %v2654_v6 = vrot.slane %v2649_v61, 1  ;;  %v2667_v7 = vrot.slane %v2662_v62, 2  ;;  %v2668_v9 = vrot.slane %v2663_v63, 2  ;;  %3825 = vmatpush3.bf16.msra.mxu0 %v4035_v51  ;;  %v4036_v61 = vld [vmem:[#allocation8 + $0x38] sm:$0xff]   ;;  %v4037_v62 = vld [vmem:[#allocation8 + $0x30] sm:$0xff]  }
 0xed4   : > { %v2643_v10 = vmul.f32 %v2642_v59, %v2636_v57  ;;  %v2681_v12 = vrot.slane %v2676_v0, 3  ;;  %v2682_v13 = vrot.slane %v2677_v1, 3  ;;  %v2695_v16 = vrot.slane %v2691_v4, 4  ;;  %3842 = vmatprep.subr.bf16.mxu0 %v4432_v8  ;;  %v3451_v57 = vld [vmem:[#allocation5 + $0xd] ss:$0 sm:$0xff]  ;;  %v4038_v63 = vld [vmem:[#allocation8 + $0x28] sm:$0xff]  }
 0xed5   : > { %v2655_v14 = vsel %vm2652_vm9, %v2653_v5, %v2654_v6  ;;  %v2669_v17 = vsel %vm2666_vm10, %v2667_v7, %v2668_v9  ;;  %v2694_v20 = vrot.slane %v2690_v3, 4  ;;  %v4039_v0 = vld [vmem:[#allocation8 + $0x20] sm:$0xff]   ;;  %v3452_v1 = vld [vmem:[%s5058_s2 + $0x1] ss:$0 sm:$0xff] }
 0xed6   : > { %v2657_v15 = vadd.f32 %v2655_v14, %v2643_v10  ;;  %v2683_v24 = vsel %vm2680_vm11, %v2681_v12, %v2682_v13 }
 0xed7   : > { %v2696_v26 = vsel %vm1943_vm6, %v2694_v20, %v2695_v16  ;;  %v4040_v16 = vld [vmem:[%s5067_s11 + $0x28] sm:$0xff]   ;;  %v3457_v20 = vld [vmem:[#allocation5 + $0xe] ss:$0 sm:$0xff] }
 0xed8   : > { %v2671_v21 = vadd.f32 %v2669_v17, %v2657_v15  ;;  %v4041_v17 = vld [vmem:[%s5067_s11 + $0x20] sm:$0xff]  }
 0xeda   : > { %v2685_v25 = vadd.f32 %v2683_v24, %v2671_v21 }
 0xedc   : > { %v2698_v28 = vadd.f32 %v2696_v26, %v2685_v25 }
 0xede   : > { %v2704_v18 = vsub.f32 %v2698_v28, %v3443_v27 }
 0xee0   : > { %v2712_v30 = vmul.f32 %v2711_v29, %v2704_v18  ;;  %v4042_v18 = vld [vmem:[%s5068_s12 + $0x10] sm:$0xff]  }
 0xee2   : > { %v2718_v31 = vmul.f32 %v3444_v19, %v2712_v30  ;;  %v3467_v19 = vld [vmem:[%s5059_s3 + $0x2] ss:$0 sm:$0xff] }
 0xee4   : > { %v2724_v32 = vadd.f32 %v3445_v22, %v2718_v31 }
 0xee6   : > { %v3446_v33 = vmul.f32 -1.442695, %v2724_v32 }
 0xee8   : > { %4083 = vpow2.f32 %v3446_v33 }
 0xef5   : > { %v4084_v34 = vpop.eup %4083 }
 0xef6   : > { %v2728_v35 = vadd.f32 1.0, %v4084_v34 }
 0xef8   : > { %4085 = vrcp.f32 %v2728_v35 }
 0xf05   : > { %v4086_v36 = vpop.eup %4085 }
 0xf06   : > { %v2731_v37 = vmul.f32 %v4086_v36, %v2724_v32 }
 0xf08   : > { %v2737_v38 = vpack.c.bf16 %v2731_v37, %v2731_v37 }
 0xf0a   : > { %3819 = vmatmul.mubr.msk.bf16.vlgmr.msra.gmra.mxu1 %vm587_vm0, %v2737_v38 }
 0xf0b   : > { %3838 = vmatprep.mubr.msk.bf16.mxu1 %vm4433_vm1, %v4432_v8  ;;  %3831 = vmatpush3.bf16.msra.mxu1 %v4036_v61 }
 0xf0c   : > { %3832 = vmatprep.subr.bf16.mxu1 %v4432_v8 }
 0xf0f   : > { %3833 = vmatpush3.bf16.msra.mxu1 %v4037_v62 }
 0xf10   : > { %3834 = vmatprep.subr.bf16.mxu1 %v4432_v8 }
 0xf13   : > { %3835 = vmatpush3.bf16.msra.mxu1 %v4038_v63 }
 0xf14   : > { %3836 = vmatprep.subr.bf16.mxu1 %v4432_v8 }
 0xf17   : > { %3837 = vmatpush3.bf16.msra.mxu1 %v4039_v0 }
 0xfca   : > { %v2787_v39 = vpop.f32.mrf.mxu1 }
 0xfcb   : > { %v4978_v40 = vadd.f32 %v2787_v39, %v4954_v2 }
 0xfcc   : > { %v3820_v41 = vpop.f32.mrf.mxu1 }
 0xfcd   : > { %v2811_v42 = vsel %vm587_vm0, %v4978_v40, 0.0 }
 0xfce   : > { %2812 = vadd.xlane.f32.xlu0 %v2811_v42  ;;  %v2790_v43 = vpop.f32.mrf.mxu1 }
 0xfd0   : > { %v3821_v44 = vpop.f32.mrf.mxu1 }
0x1057   : > { %v2813_v45 = vpop.xlane.xlu0 %2812 }
0x1058   : > { %v2814_v46 = vmul.f32 0.03125, %v2813_v45 }
0x105a   : > { %v2815_v47 = vsub.f32 %v4978_v40, %v2814_v46 }
0x105c   : > { %v2816_v48 = vmul.f32 %v2815_v47, %v2815_v47 }
0x105e   : > { %v2817_v49 = vsel %vm587_vm0, %v2816_v48, 0.0 }
0x105f   : > { %2818 = vadd.xlane.f32.xlu1 %v2817_v49 }
0x10e8   : > { %v2819_v2 = vpop.xlane.xlu1 %2818 }
0x10e9   : > { %v2820_v52 = vmul.f32 0.03125, %v2819_v2 }
0x10eb   : > { %v2821_v53 = vadd.f32 1e-05, %v2820_v52 }
0x10ed   : > { %4087 = vrsqrt.f32 %v2821_v53 }
0x10fa   : > { %v4088_v54 = vpop.eup %4087 }
0x10fb   : > { %v2823_v56 = vmul.f32 %v4088_v54, %v2815_v47 }
0x10fd   : > { %v2828_v58 = vmul.f32 %v3450_v55, %v2823_v56 }
0x10ff   : > { %v2833_v59 = vadd.f32 %v3451_v57, %v2828_v58  ;;  %v3473_v58 = vld [vmem:[#allocation5 + $0x11] ss:$0 sm:$0xff] }
0x1101   : > { %v2834_v60 = vpack.c.bf16 %v2833_v59, %v2833_v59 }
0x1103   : > { %3827 = vmatmul.mubr.msk.bf16.vlgmr.msra.gmra.mxu0 %vm587_vm0, %v2834_v60 }
0x1104   : > { %3846 = vmatprep.mubr.msk.bf16.mxu0 %vm4433_vm1, %v4432_v8  ;;  %3843 = vmatpush3.bf16.msra.mxu0 %v4040_v16 }
0x1105   : > { %3844 = vmatprep.subr.bf16.mxu0 %v4432_v8 }
0x1108   : > { %3845 = vmatpush3.bf16.msra.mxu0 %v4041_v17 }
0x1109   : > { %3850 = vmatprep.subr.bf16.mxu0 %v4432_v8 }
0x11c3   : > { %v2888_v3 = vpop.f32.mrf.mxu0 }
0x11c4   : > { %v2889_v4 = vadd.f32 %v3452_v1, %v2888_v3 }
0x11c5   : > { %v3828_v5 = vpop.f32.mrf.mxu0 }
0x11c6   : > { %v3456_v6 = vmul.f32 -1.442695, %v2889_v4 }
0x11c7   : > { %v2891_v7 = vpop.f32.mrf.mxu0 }
0x11c8   : > { %4089 = vpow2.f32 %v3456_v6 }
0x11c9   : > { %v3829_v9 = vpop.f32.mrf.mxu0 }
0x11d5   : > { %v4090_v10 = vpop.eup %4089 }
0x11d6   : > { %v2897_v12 = vadd.f32 1.0, %v4090_v10 }
0x11d8   : > { %4091 = vrcp.f32 %v2897_v12 }
0x11e5   : > { %v4092_v13 = vpop.eup %4091 }
0x11e6   : > { %v2900_v14 = vmul.f32 %v4092_v13, %v2889_v4  ;;  %v3476_v13 = vld [vmem:[#allocation5 + $0x12] ss:$0 sm:$0xff] }
0x11e8   : > { %v2901_v15 = vpack.c.bf16 %v2900_v14, %v2900_v14 }
0x11ea   : > { %3839 = vmatmul.mubr.msk.bf16.vlgmr.msra.gmra.mxu1 %vm709_vm2, %v2901_v15  ;;  %v3477_v15 = vld [vmem:[#allocation5 + $0x13] ss:$0 sm:$0xff] }
0x12aa   : > { %v2968_v21 = vpop.f32.mrf.mxu1 }
0x12ab   : > { %v2969_v23 = vadd.f32 %v3457_v20, %v2968_v21 }
0x12ac   : > { %v3840_v24 = vpop.f32.mrf.mxu1 }
0x12ad   : > { %v2974_v25 = vmul.f32 0.5, %v2969_v23 }
0x12ae   : > { %v2971_v26 = vpop.f32.mrf.mxu1 }
0x12af   : > { %v2975_v27 = vadd.f32 %v2974_v25, %v4978_v40 }
0x12b0   : > { %v3841_v28 = vpop.f32.mrf.mxu1 }
0x12b1   : > { %v2981_v29 = vpack.c.bf16 %v2975_v27, %v2975_v27 }
0x12b3   : > { %3847 = vmatmul.mubr.msk.bf16.vlgmr.msra.gmra.mxu0 %vm587_vm0, %v2981_v29 }
0x12b4   : > { %3852 = vmatprep.mubr.msk.bf16.mxu0 %vm4433_vm1, %v4432_v8  ;;  %3851 = vmatpush3.bf16.msra.mxu0 %v4042_v18 }
0x1373   : > { %v3036_v30 = vpop.f32.mrf.mxu0 }
0x1374   : > { %v3037_v22 = vadd.f32 %v3467_v19, %v3036_v30 }
0x1375   : > { %v3848_v31 = vpop.f32.mrf.mxu0 }
0x1376   : > { %v3043_v32 = vmul.f32 0.70710677, %v3037_v22  ;;  %v3042_v54 = vmul.f32 0.5, %v3037_v22 }
0x1377   : > { %v3039_v33 = vpop.f32.mrf.mxu0 }
0x1378   : > { %v3046_v34 = vand.u32 2147483647, %v3043_v32  ;;  %vm3044_vm12 = vcmp.ge.f32.partialorder %v3043_v32, 0.0 }
0x1379   : > { %v3849_v35 = vpop.f32.mrf.mxu0  ;;  %v3045_v52 = vsel %vm3044_vm12, 1.0, %v4434_v11 }
0x137a   : > { %v3047_v36 = vmul.f32 0.3275911, %v3046_v34  ;;  %v3060_v8 = vsub.f32 0.0, %v3046_v34 }
0x137c   : > { %v3048_v37 = vadd.f32 1.0, %v3047_v36  ;;  %v3061_v38 = vmul.f32 %v3060_v8, %v3046_v34 }
0x137e   : > { %4093 = vrcp.f32 %v3048_v37  ;;  %v3062_v41 = vmul.f32 1.442695, %v3061_v38 }
0x1380   : > { %4095 = vpow2.f32 %v3062_v41 }
0x138b   : > { %v4094_v39 = vpop.eup %4093 }
0x138c   : > { %v3051_v40 = vmul.f32 1.0614054, %v4094_v39 }
0x138d   : > { %v4096_v50 = vpop.eup %4095 }
0x138e   : > { %v3052_v42 = vadd.f32 -1.4531521, %v3051_v40 }
0x1390   : > { %v3053_v43 = vmul.f32 %v4094_v39, %v3052_v42 }
0x1392   : > { %v3054_v44 = vadd.f32 1.4214138, %v3053_v43 }
0x1394   : > { %v3055_v45 = vmul.f32 %v4094_v39, %v3054_v44 }
0x1396   : > { %v3056_v46 = vadd.f32 -0.28449672, %v3055_v45 }
0x1398   : > { %v3057_v47 = vmul.f32 %v4094_v39, %v3056_v46 }
0x139a   : > { %v3058_v48 = vadd.f32 0.2548296, %v3057_v47 }
0x139c   : > { %v3059_v49 = vmul.f32 %v4094_v39, %v3058_v48 }
0x139e   : > { %v3064_v51 = vmul.f32 %v4096_v50, %v3059_v49 }
0x13a0   : > { %v3065_v2 = vsub.f32 1.0, %v3064_v51 }
0x13a2   : > { %v3066_v53 = vmul.f32 %v3065_v2, %v3045_v52 }
0x13a4   : > { %v3067_v55 = vadd.f32 1.0, %v3066_v53 }
0x13a6   : > { %v3068_v56 = vmul.f32 %v3067_v55, %v3042_v54 }
0x13a8   : > { %v3072_v57 = vpack.c.bf16 %v3068_v56, %v3068_v56 }
0x13aa   : > { %3853 = vmatmul.mubr.msk.bf16.vlgmr.msra.gmra.mxu0 %vm861_vm4, %v3072_v57 }
0x146a   : > { %v3121_v59 = vpop.f32.mrf.mxu0 }
0x146b   : > { %v3122_v60 = vadd.f32 %v3473_v58, %v3121_v59 }
0x146c   : > { %v3854_v61 = vpop.f32.mrf.mxu0 }
0x146d   : > { %v3127_v62 = vadd.f32 %v3122_v60, %v2975_v27 }
0x146e   : > { %v3124_v63 = vpop.f32.mrf.mxu0 }
0x146f   : > { %v3130_v0 = vsel %vm587_vm0, %v3127_v62, 0.0 }
0x1470   : > { %3131 = vadd.xlane.f32.xlu0 %v3130_v0  ;;  %v3855_v1 = vpop.f32.mrf.mxu0 }
0x14f9   : > { %v3132_v11 = vpop.xlane.xlu0 %3131 }
0x14fa   : > { %v3133_v3 = vmul.f32 0.03125, %v3132_v11 }
0x14fc   : > { %v3134_v4 = vsub.f32 %v3127_v62, %v3133_v3 }
0x14fe   : > { %v3135_v5 = vmul.f32 %v3134_v4, %v3134_v4 }
0x1500   : > { %v3136_v6 = vsel %vm587_vm0, %v3135_v5, 0.0 }
0x1501   : > { %3137 = vadd.xlane.f32.xlu1 %v3136_v6 }
0x158a   : > { %v3138_v7 = vpop.xlane.xlu1 %3137 }
0x158b   : > { %v3139_v9 = vmul.f32 0.03125, %v3138_v7 }
0x158d   : > { %v3140_v10 = vadd.f32 1e-05, %v3139_v9 }
0x158f   : > { %4097 = vrsqrt.f32 %v3140_v10 }
0x159c   : > { %v4098_v12 = vpop.eup %4097 }
0x159d   : > { %v3142_v14 = vmul.f32 %v4098_v12, %v3134_v4 }
0x159f   : > { %v3147_v16 = vmul.f32 %v3476_v13, %v3142_v14 }
0x15a1   : > { %v3152_v17 = vadd.f32 %v3477_v15, %v3147_v16 }
0x15a3   : > { %3153 = vst.msk [vmem:[%s569_s5] sm:$0xff] %vm587_vm0, %v3152_v17 }
0x15a4   : > { %4348 = shalt.err (!%p4345_p4)
}
0x15a5   : > { %s4349_s13 = scalar_lea.hbm %s3166_s17, 128  ;;  %s4353_s8 = scalar_lea.hbm %s5114_s1, 256 }
0x15a6   : > { %p4350_p6 = scmp.ne.s32.totalorder %s3166_s17, %s4349_s13  ;;  %p4354_p7 = scmp.lt.s32.totalorder %s3166_s17, %s5114_s1 }
0x15a7   : > { %p4355_p11 = scmp.lt.s32.totalorder %s4353_s8, %s4349_s13 }
0x15a8   : > { %p4351_p8 = pnand %p4350_p6, %p5115_p5 }
0x15a9   : > { %p4356_p2 = por %p4355_p11, %p4354_p7 }
0x15aa   : > { %p4352_p10 = pneg %p4351_p8 }
0x15ac   : > { %p4357_p0 = pnand %p4356_p2, %p4352_p10 }
0x15ae   : > { %4360 = shalt.err (!%p4357_p0)
}
0x15af   : > { %3890 = dma.vmem_to_hbm [thread:$0]  (%p5115_p5), %s3169_s6, 128, %s3166_s17, %s3155_s24  }
0x15b0 PF: > { %s3180_s5 = sand.u32 1, %s4403_s25   ;;  %p5116_p9 = scmp.ne.s32.totalorder %s5102_s23, 0 }
0x15b1   : > { %p5117_p12 = scmp.ge.s32.totalorder %s4415_s28, 2  ;;  %s3181_s15 = scalar_lea.sflag [#allocation4], %s3180_s5 }
0x15b3   : > { %p3922_p13 = pnand %p5117_p12, %p5116_p9 }
0x15b5   : > { %p3923_p1 = pneg %p3922_p13 }
0x15b7   : > { %4398 = dma.done.wait (%p3923_p1), %s3181_s15, 128  }
0x15b8   : > { %4400 = vsyncadd (%p3923_p1), %s3181_s15, 4294967168  ;;  %p30_p3 = scmp.ge.s32.totalorder %s4634_s16, 4   ;;  %s5118_s25 = smov %s4407_s26 }
0x15b9   : > { %s5119_s26 = smov %s4411_s27  ;;  %s5120_s27 = smov %s4645_s20 }
0x15ba   : > { %s5121_s28 = smov %s4634_s16  ;;  %32 = sbr.rel (!%p30_p3) target bundleno = 18 (0x12), region = 157 }
0x15bf   :  { %3186 = vsyncpa [#allocation3], 1 }
0x15c0   :  { %3188 = vsyncpa [#allocation3 + $0x1], 1 }
0x15c1   :  { %3189 = vsyncpa [#allocation6], 1 }
0x15c2   :  { %3190 = vsyncpa [#allocation9], 1 }
0x15c3   :  { %3191 = vsyncpa [#allocation12], 1 }
0x15c4   :  { %3192 = vsyncpa [#allocation15], 1 }
0x15c5   :  { %3193 = vsyncpa [#allocation4], 1 }
0x15c6   :  { %3195 = vsyncpa [#allocation4 + $0x1], 1 }

</bundles_post_ra>
